<compile_context>
chip_gen: v6e
topology: v6e:2x2x1
jax: 0.10.0
libtpu: 0.0.40
codegen_flags: <defaults>
</compile_context>

<pallas_src>
import functools

import jax
import jax.numpy as jnp
from jax.experimental import pallas as pl
from jax.experimental.pallas import tpu as pltpu

BN_EPS = 1e-5          # nn.BatchNorm1d default
NORM_EPS = 1e-12       # F.normalize default
_LANE = 128
_SUBLANE = 8


def _cdiv(a, b):
    return -(-a // b)


def _round_up(x, m):
    return _cdiv(x, m) * m


def _detect_vmem_bytes():
    """Physical VMEM of the attached TPU (falls back to the smallest, v7x)."""
    try:
        info = pltpu.get_tpu_info()
        for name in ("vmem_capacity_bytes", "vmem_size_bytes", "vmem_bytes"):
            v = getattr(info, name, None)
            if isinstance(v, int) and v > 0:
                return v
    except Exception:
        pass
    return 64 * 1024 * 1024


def _spec(shape, index_map, buffers=None):
    """BlockSpec with optional pipeline depth; falls back if kwarg unsupported."""
    if buffers is not None:
        try:
            return pl.BlockSpec(shape, index_map, pipeline_mode=pl.Buffered(buffers))
        except Exception:
            pass
    return pl.BlockSpec(shape, index_map)


def _multihead_kernel(scale1, inv_hw,
                      x_ref,       # (TB, C, TH)  x tile: C on sublanes, HW on lanes
                      wfe_ref,     # (Cs, Ep)     synthetic backbone linear
                      w1_ref,      # (Ep, Mp)     emb Linear 1 (no bias)
                      s_ref,       # (1, Mp)      folded BN scale
                      b_ref,       # (1, Mp)      folded BN bias (incl. backbone bias)
                      w2_ref,      # (Mp, Ep)     emb Linear 2 (no bias)
                      wcls_ref,    # (Ep, NCp)    classifier weight (no bias)
                      emb_ref,     # (TB, Ep)     out: embedding
                      logits_ref,  # (TB, NCp)    out: scaled logits
                      acc_ref):    # (TB, Cs)     f32 scratch: GAP partial sums
    hw = pl.program_id(1)
    c = x_ref.shape[1]

    @pl.when(hw == 0)
    def _():
        acc_ref[...] = jnp.zeros_like(acc_ref)

    # ---- global average pool: partial spatial sums over the lane axis (f32) ----
    acc_ref[:, :c] += jnp.sum(x_ref[...], axis=-1).astype(jnp.float32)

    @pl.when(hw == pl.num_programs(1) - 1)
    def _():
        feat = acc_ref[...] * inv_hw                                    # (TB, Cs) GAP

        # ---- synthetic backbone Linear (bias folded into BN bias) ----
        f = jnp.dot(feat, wfe_ref[...], preferred_element_type=jnp.float32)

        # ---- Dropout(eval) == identity ----

        # ---- emb MLP: Linear -> folded BN(eval) -> ReLU -> Linear -> Tanh ----
        h = jnp.dot(f, w1_ref[...], preferred_element_type=jnp.float32)
        h = jnp.maximum(h * s_ref[...] + b_ref[...], 0.0)
        emb = jnp.tanh(jnp.dot(h, w2_ref[...], preferred_element_type=jnp.float32))
        emb_ref[...] = emb

        # ---- ScaledLogitClassifier: L2 normalize (dim=1) -> Linear -> scale ----
        sumsq = jnp.sum(emb * emb, axis=1, keepdims=True)
        inv_norm = jax.lax.rsqrt(jnp.maximum(sumsq, NORM_EPS * NORM_EPS))
        logits_ref[...] = (jnp.dot(emb * inv_norm, wcls_ref[...],
                                   preferred_element_type=jnp.float32) * scale1)


def multihead_forward(x_nchw, params, *, scale1=30.0):
    """Runs MultiheadModel.forward(x, target=None).

    Returns a dict mimicking MultiHeadModelOutput:
      {"emb": (B, E), "cls_logits": (B, n_classes), "angular_logits": None}
    """
    B, C, H, W = x_nchw.shape
    HW = H * W
    E, M = params["w1"].shape
    NC = params["w_cls"].shape[1]

    Cs = _round_up(C, _SUBLANE)    # pad only the tiny weights/scratch, never x's C
    Ep = _round_up(E, _LANE)
    Mp = _round_up(M, _LANE)
    NCp = _round_up(NC, _LANE)

    # ---- batch tiling: fix TB and pad B up (never shrink TB to fit) ----
    Bp0 = _round_up(B, _SUBLANE)
    nb = max(_cdiv(Bp0, 128), 2 if Bp0 >= 16 else 1)   # >=2 parallel steps -> both v7x TCs
    TB = _round_up(_cdiv(Bp0, nb), _SUBLANE)
    Bp = nb * TB

    # ---- VMEM budget, derived from the attached chip ----
    vmem_phys = _detect_vmem_bytes()
    vmem_limit = min((vmem_phys * 3) // 4, 100 * 1024 * 1024)  # ~96MiB v5e/v6e, ~48MiB v7x
    itemsize = jnp.dtype(x_nchw.dtype).itemsize
    w_bytes = 4 * (Cs * Ep + Ep * Mp + 2 * Mp + Mp * Ep + Ep * NCp)
    fixed = 2 * w_bytes + 2 * 4 * TB * (Ep + NCp) + 4 * TB * max(Cs, _LANE) + (4 << 20)
    x_budget = max(vmem_limit - fixed, 4 << 20)

    # ---- spatial tiling: HW stays on the lane axis, streamed in native layout ----
    x = x_nchw.reshape(B, C, HW)                       # free reshape, no relayout/copy
    if HW <= _LANE or 2 * TB * C * HW * itemsize <= x_budget:
        TH, nhw, x_bufs, HWp = HW, 1, None, HW         # whole spatial extent in one step
    else:
        x_bufs = 3                                     # hide the epilogue behind next DMA
        max_th = max(_LANE, (x_budget // x_bufs) // (TB * C * itemsize))
        max_th = min(max_th // _LANE * _LANE, HW // _LANE * _LANE)
        max_th = max(max_th, _LANE)
        TH = 0
        for k in range(max_th // _LANE, 0, -1):        # prefer TH dividing HW: no HW pad
            if HW % (k * _LANE) == 0:
                TH = k * _LANE
                break
        if TH == 0:
            TH = max_th
        HWp = _round_up(HW, TH)
        nhw = HWp // TH

    pad_b, pad_hw = Bp - B, HWp - HW
    if pad_b or pad_hw:
        x = jnp.pad(x, ((0, pad_b), (0, 0), (0, pad_hw)))   # zeros: exact for GAP sums

    # ---- small weights: pad to lane/sublane multiples, fold eval-mode BN ----
    f32 = jnp.float32
    w_fe = jnp.pad(params["w_fe"].astype(f32), ((0, Cs - C), (0, Ep - E)))
    w1 = jnp.pad(params["w1"].astype(f32), ((0, Ep - E), (0, Mp - M)))
    w2 = jnp.pad(params["w2"].astype(f32), ((0, Mp - M), (0, Ep - E)))
    w_cls = jnp.pad(params["w_cls"].astype(f32), ((0, Ep - E), (0, NCp - NC)))
    bn_scale = params["bn_gamma"] * jax.lax.rsqrt(params["bn_var"] + BN_EPS)
    bn_bias = (params["bn_beta"] - params["bn_mean"] * bn_scale
               + jnp.dot(params["b_fe"], params["w1"]) * bn_scale)     # fold b_fe (eval)
    bn_scale = jnp.pad(bn_scale.astype(f32), ((0, 0), (0, Mp - M)))
    bn_bias = jnp.pad(bn_bias.astype(f32), ((0, 0), (0, Mp - M)))

    kernel = functools.partial(_multihead_kernel, float(scale1), 1.0 / float(HW))
    grid = (Bp // TB, nhw)

    def _build_specs(opt):
        wbuf = 1 if opt else None           # resident weights: single buffer (VMEM win)
        xbuf = x_bufs if opt else None
        const = lambda shape: _spec(shape, lambda b, hw: (0,) * len(shape), wbuf)
        return [
            _spec((TB, C, TH), lambda b, hw: (b, 0, hw), xbuf),   # x (streamed)
            const((Cs, Ep)),     # w_fe
            const((Ep, Mp)),     # w1
            const((1, Mp)),      # bn_scale
            const((1, Mp)),      # bn_bias
            const((Mp, Ep)),     # w2
            const((Ep, NCp)),    # w_cls
        ]

    def _call(opt):
        out = pl.pallas_call(
            kernel,
            out_shape=(
                jax.ShapeDtypeStruct((Bp, Ep), jnp.float32),
                jax.ShapeDtypeStruct((Bp, NCp), jnp.float32),
            ),
            grid_spec=pltpu.PrefetchScalarGridSpec(
                num_scalar_prefetch=0,
                grid=grid,
                in_specs=_build_specs(opt),
                out_specs=[
                    pl.BlockSpec((TB, Ep), lambda b, hw: (b, 0)),
                    pl.BlockSpec((TB, NCp), lambda b, hw: (b, 0)),
                ],
                scratch_shapes=[pltpu.VMEM((TB, Cs), jnp.float32)],
            ),
            compiler_params=pltpu.CompilerParams(
                dimension_semantics=("parallel", "arbitrary"),
                vmem_limit_bytes=int(vmem_limit),
            ),
        )(x, w_fe, w1, bn_scale, bn_bias, w2, w_cls)
        return jax.block_until_ready(out)

    try:
        emb_p, logits_p = _call(True)
    except Exception:
        emb_p, logits_p = _call(False)      # conservative pipeline depths (safe default)

    emb = emb_p[:B, :E]
    logits = logits_p[:B, :NC]
    # MarginHead.forward(emb, None) -> None
    return {"emb": emb, "cls_logits": logits, "angular_logits": None}


def multihead_reference(x_nchw, params, *, scale1=30.0):
    """Pure-JAX f32 reference (mirrors the PyTorch eval-mode forward)."""
    B, C, H, W = x_nchw.shape
    feat = jnp.mean(x_nchw.reshape(B, C, H * W), axis=-1)
    f = feat @ params["w_fe"] + params["b_fe"]
    h = f @ params["w1"]
    h = (h - params["bn_mean"]) * jax.lax.rsqrt(params["bn_var"] + BN_EPS)
    h = h * params["bn_gamma"] + params["bn_beta"]
    h = jnp.maximum(h, 0.0)
    emb = jnp.tanh(h @ params["w2"])
    norm = jnp.sqrt(jnp.sum(emb * emb, axis=1, keepdims=True))
    emb_n = emb / jnp.maximum(norm, NORM_EPS)
    logits = emb_n @ params["w_cls"] * scale1
    return emb, logits


def init_params(key, *, in_channels, emb_size, middle, n_classes):
    """Deterministic synthetic parameter init (this is not a checkpoint load)."""
    ks = jax.random.split(key, 6)
    return {
        # synthetic backbone (GAP + Linear(C -> emb_size) with bias)
        "w_fe": jax.random.normal(ks[0], (in_channels, emb_size), jnp.float32) * 0.1,
        "b_fe": jax.random.normal(ks[1], (1, emb_size), jnp.float32) * 0.1,
        # embedding MLP
        "w1": jax.random.normal(ks[2], (emb_size, middle), jnp.float32) * 0.1,
        "bn_gamma": jnp.ones((1, middle), jnp.float32),
        "bn_beta": jnp.zeros((1, middle), jnp.float32),
        "bn_mean": jnp.zeros((1, middle), jnp.float32),
        "bn_var": jnp.ones((1, middle), jnp.float32),
        "w2": jax.random.normal(ks[3], (middle, emb_size), jnp.float32) * 0.1,
        # ScaledLogitClassifier
        "w_cls": jax.random.normal(ks[4], (emb_size, n_classes), jnp.float32) * 0.1,
    }


if __name__ == "__main__":
    # Small, forward-consistent shapes.
    B, C, H, W = 2, 4, 16, 16
    EMB_SIZE, MIDDLE = 32, 16
    N_CLASSES_BASE = 10
    SEP_SIDE_TRAIN = True
    n_classes = N_CLASSES_BASE * 2 if SEP_SIDE_TRAIN else N_CLASSES_BASE  # = 20

    key = jax.random.PRNGKey(0)
    k_x, k_p = jax.random.split(key)
    x = jax.random.normal(k_x, (B, C, H, W), jnp.float32)   # NCHW, like PyTorch
    params = init_params(k_p, in_channels=C, emb_size=EMB_SIZE,
                         middle=MIDDLE, n_classes=n_classes)

    out = multihead_forward(x, params, scale1=30.0)
    jax.block_until_ready((out["emb"], out["cls_logits"]))

    assert out["emb"].shape == (B, EMB_SIZE)
    assert out["cls_logits"].shape == (B, n_classes)
    assert out["angular_logits"] is None

    # Numerical check vs. f32 reference (kernel path is f32 end to end now).
    emb_ref, logits_ref = multihead_reference(x, params, scale1=30.0)
    assert jnp.allclose(out["emb"], emb_ref, atol=1e-2, rtol=1e-2), "emb mismatch"
    assert jnp.allclose(out["cls_logits"], logits_ref, atol=5e-2, rtol=1e-2), "logits mismatch"

    print("KERNEL_OK")
</pallas_src>

<mosaic_0001>
module attributes {stable_mosaic.version = 11 : i64} {
  func.func @_multihead_kernel(%arg0: i32, %arg1: i32, %arg2: memref<8x4x256xf32, #tpu.memory_space<vmem>>, %arg3: memref<8x128xf32, #tpu.memory_space<vmem>>, %arg4: memref<128x128xf32, #tpu.memory_space<vmem>>, %arg5: memref<1x128xf32, #tpu.memory_space<vmem>>, %arg6: memref<1x128xf32, #tpu.memory_space<vmem>>, %arg7: memref<128x128xf32, #tpu.memory_space<vmem>>, %arg8: memref<128x128xf32, #tpu.memory_space<vmem>>, %arg9: memref<8x128xf32, #tpu.memory_space<vmem>>, %arg10: memref<8x128xf32, #tpu.memory_space<vmem>>, %arg11: memref<8x8xf32, #tpu.memory_space<vmem>>) attributes {dimension_semantics = [#tpu.dimension_semantics<parallel>, #tpu.dimension_semantics<arbitrary>], iteration_bounds = array<i64: 1, 1>, scalar_prefetch = 0 : i64, scratch_operands = 1 : i64, tpu.core_type = #tpu.core_type<tc>, window_params = [{transform_indices = @transform_0, window_bounds = array<i64: 8, 4, 256>}, {pipeline_mode = #tpu.pipeline_mode<synchronous>, transform_indices = @transform_1, window_bounds = array<i64: 8, 128>}, {pipeline_mode = #tpu.pipeline_mode<synchronous>, transform_indices = @transform_2, window_bounds = array<i64: 128, 128>}, {pipeline_mode = #tpu.pipeline_mode<synchronous>, transform_indices = @transform_3, window_bounds = array<i64: 1, 128>}, {pipeline_mode = #tpu.pipeline_mode<synchronous>, transform_indices = @transform_4, window_bounds = array<i64: 1, 128>}, {pipeline_mode = #tpu.pipeline_mode<synchronous>, transform_indices = @transform_5, window_bounds = array<i64: 128, 128>}, {pipeline_mode = #tpu.pipeline_mode<synchronous>, transform_indices = @transform_6, window_bounds = array<i64: 128, 128>}, {transform_indices = @transform_7, window_bounds = array<i64: 8, 128>}, {transform_indices = @transform_8, window_bounds = array<i64: 8, 128>}]} {
    %c0_i32 = arith.constant 0 : i32
    %0 = arith.cmpi eq, %arg1, %c0_i32 : i32
    %1 = arith.extui %0 : i1 to i32
    %c0_i32_0 = arith.constant 0 : i32
    %2 = arith.cmpi ne, %1, %c0_i32_0 : i32
    scf.if %2 {
      %cst_9 = arith.constant 0.000000e+00 : f32
      %11 = vector.broadcast %cst_9 : f32 to vector<8x8xf32>
      %c0_10 = arith.constant 0 : index
      %c0_11 = arith.constant 0 : index
      %12 = vector.load %arg11[%c0_10, %c0_11] : memref<8x8xf32, #tpu.memory_space<vmem>>, vector<8x8xf32>
      tpu.vector_store %arg11[%c0_10, %c0_11], %11 {strides = array<i32>} : memref<8x8xf32, #tpu.memory_space<vmem>>, vector<8x8xf32>,
    } else {
    }
    %c0 = arith.constant 0 : index
    %c0_1 = arith.constant 0 : index
    %3 = vector.load %arg11[%c0, %c0_1] : memref<8x8xf32, #tpu.memory_space<vmem>>, vector<8x4xf32>
    %c0_2 = arith.constant 0 : index
    %c0_3 = arith.constant 0 : index
    %c0_4 = arith.constant 0 : index
    %4 = vector.load %arg2[%c0_2, %c0_3, %c0_4] : memref<8x4x256xf32, #tpu.memory_space<vmem>>, vector<8x4x256xf32>
    %cst = arith.constant dense<0.000000e+00> : vector<8x4xf32>
    %5 = vector.multi_reduction <add>, %4, %cst [2] : vector<8x4x256xf32> to vector<8x4xf32>
    %6 = arith.addf %3, %5 : vector<8x4xf32>
    %c0_5 = arith.constant 0 : index
    %c0_6 = arith.constant 0 : index
    %7 = vector.load %arg11[%c0_5, %c0_6] : memref<8x8xf32, #tpu.memory_space<vmem>>, vector<8x4xf32>
    tpu.vector_store %arg11[%c0_5, %c0_6], %6 {strides = array<i32>} : memref<8x8xf32, #tpu.memory_space<vmem>>, vector<8x4xf32>,
    %c0_i32_7 = arith.constant 0 : i32
    %8 = arith.cmpi eq, %arg1, %c0_i32_7 : i32
    %9 = arith.extui %8 : i1 to i32
    %c0_i32_8 = arith.constant 0 : i32
    %10 = arith.cmpi ne, %9, %c0_i32_8 : i32
    scf.if %10 {
      %c0_9 = arith.constant 0 : index
      %c0_10 = arith.constant 0 : index
      %11 = vector.load %arg11[%c0_9, %c0_10] : memref<8x8xf32, #tpu.memory_space<vmem>>, vector<8x8xf32>
      %cst_11 = arith.constant 3.906250e-03 : f32
      %12 = vector.broadcast %cst_11 : f32 to vector<8x8xf32>
      %13 = arith.mulf %11, %12 : vector<8x8xf32>
      %c0_12 = arith.constant 0 : index
      %c0_13 = arith.constant 0 : index
      %14 = vector.load %arg3[%c0_12, %c0_13] : memref<8x128xf32, #tpu.memory_space<vmem>>, vector<8x128xf32>
      %cst_14 = arith.constant dense<0.000000e+00> : vector<8x128xf32>
      %15 = tpu.matmul %13, %14, %cst_14 {dimension_numbers = #tpu.dot_dimension_numbers<[1], [0], [0], [1], [0, 0, 1, 1], [], []>} : vector<8x8xf32>, vector<8x128xf32>, vector<8x128xf32> -> vector<8x128xf32>
      %c0_15 = arith.constant 0 : index
      %c0_16 = arith.constant 0 : index
      %16 = vector.load %arg4[%c0_15, %c0_16] : memref<128x128xf32, #tpu.memory_space<vmem>>, vector<128x128xf32>
      %cst_17 = arith.constant dense<0.000000e+00> : vector<8x128xf32>
      %17 = tpu.matmul %15, %16, %cst_17 {dimension_numbers = #tpu.dot_dimension_numbers<[1], [0], [0], [1], [0, 0, 1, 1], [], []>} : vector<8x128xf32>, vector<128x128xf32>, vector<8x128xf32> -> vector<8x128xf32>
      %c0_18 = arith.constant 0 : index
      %c0_19 = arith.constant 0 : index
      %18 = vector.load %arg5[%c0_18, %c0_19] : memref<1x128xf32, #tpu.memory_space<vmem>>, vector<1x128xf32>
      %19 = vector.broadcast %18 : vector<1x128xf32> to vector<8x128xf32>
      %20 = arith.mulf %17, %19 : vector<8x128xf32>
      %c0_20 = arith.constant 0 : index
      %c0_21 = arith.constant 0 : index
      %21 = vector.load %arg6[%c0_20, %c0_21] : memref<1x128xf32, #tpu.memory_space<vmem>>, vector<1x128xf32>
      %22 = vector.broadcast %21 : vector<1x128xf32> to vector<8x128xf32>
      %23 = arith.addf %20, %22 : vector<8x128xf32>
      %cst_22 = arith.constant 0.000000e+00 : f32
      %24 = vector.broadcast %cst_22 : f32 to vector<8x128xf32>
      %25 = arith.maximumf %23, %24 : vector<8x128xf32>
      %c0_23 = arith.constant 0 : index
      %c0_24 = arith.constant 0 : index
      %26 = vector.load %arg7[%c0_23, %c0_24] : memref<128x128xf32, #tpu.memory_space<vmem>>, vector<128x128xf32>
      %cst_25 = arith.constant dense<0.000000e+00> : vector<8x128xf32>
      %27 = tpu.matmul %25, %26, %cst_25 {dimension_numbers = #tpu.dot_dimension_numbers<[1], [0], [0], [1], [0, 0, 1, 1], [], []>} : vector<8x128xf32>, vector<128x128xf32>, vector<8x128xf32> -> vector<8x128xf32>
      %28 = math.tanh %27 : vector<8x128xf32>
      %c0_26 = arith.constant 0 : index
      %c0_27 = arith.constant 0 : index
      %29 = vector.load %arg9[%c0_26, %c0_27] : memref<8x128xf32, #tpu.memory_space<vmem>>, vector<8x128xf32>
      tpu.vector_store %arg9[%c0_26, %c0_27], %28 {strides = array<i32>} : memref<8x128xf32, #tpu.memory_space<vmem>>, vector<8x128xf32>,
      %30 = arith.mulf %28, %28 : vector<8x128xf32>
      %cst_28 = arith.constant dense<0.000000e+00> : vector<8xf32>
      %31 = vector.multi_reduction <add>, %30, %cst_28 [1] : vector<8x128xf32> to vector<8xf32>
      %32 = vector.shape_cast %31 : vector<8xf32> to vector<8x1xf32>
      %cst_29 = arith.constant 1.000000e-24 : f32
      %33 = vector.broadcast %cst_29 : f32 to vector<8x1xf32>
      %34 = arith.maximumf %32, %33 : vector<8x1xf32>
      %35 = math.rsqrt %34 : vector<8x1xf32>
      %36 = vector.broadcast %35 : vector<8x1xf32> to vector<8x128xf32>
      %37 = arith.mulf %28, %36 : vector<8x128xf32>
      %c0_30 = arith.constant 0 : index
      %c0_31 = arith.constant 0 : index
      %38 = vector.load %arg8[%c0_30, %c0_31] : memref<128x128xf32, #tpu.memory_space<vmem>>, vector<128x128xf32>
      %cst_32 = arith.constant dense<0.000000e+00> : vector<8x128xf32>
      %39 = tpu.matmul %37, %38, %cst_32 {dimension_numbers = #tpu.dot_dimension_numbers<[1], [0], [0], [1], [0, 0, 1, 1], [], []>} : vector<8x128xf32>, vector<128x128xf32>, vector<8x128xf32> -> vector<8x128xf32>
      %cst_33 = arith.constant 3.000000e+01 : f32
      %40 = vector.broadcast %cst_33 : f32 to vector<8x128xf32>
      %41 = arith.mulf %39, %40 : vector<8x128xf32>
      %c0_34 = arith.constant 0 : index
      %c0_35 = arith.constant 0 : index
      %42 = vector.load %arg10[%c0_34, %c0_35] : memref<8x128xf32, #tpu.memory_space<vmem>>, vector<8x128xf32>
      tpu.vector_store %arg10[%c0_34, %c0_35], %41 {strides = array<i32>} : memref<8x128xf32, #tpu.memory_space<vmem>>, vector<8x128xf32>,
    } else {
    }
    return
  }
  func.func @transform_0(%arg0: i32, %arg1: i32) -> (i32, i32, i32) {
    %c0_i32 = arith.constant 0 : i32
    %c0_i32_0 = arith.constant 0 : i32
    return %arg0, %c0_i32, %arg1 : i32, i32, i32
  }
  func.func @transform_1(%arg0: i32, %arg1: i32) -> (i32, i32) {
    %c0_i32 = arith.constant 0 : i32
    %c0_i32_0 = arith.constant 0 : i32
    %c0_i32_1 = arith.constant 0 : i32
    return %c0_i32, %c0_i32_0 : i32, i32
  }
  func.func @transform_2(%arg0: i32, %arg1: i32) -> (i32, i32) {
    %c0_i32 = arith.constant 0 : i32
    %c0_i32_0 = arith.constant 0 : i32
    %c0_i32_1 = arith.constant 0 : i32
    return %c0_i32, %c0_i32_0 : i32, i32
  }
  func.func @transform_3(%arg0: i32, %arg1: i32) -> (i32, i32) {
    %c0_i32 = arith.constant 0 : i32
    %c0_i32_0 = arith.constant 0 : i32
    %c0_i32_1 = arith.constant 0 : i32
    return %c0_i32, %c0_i32_0 : i32, i32
  }
  func.func @transform_4(%arg0: i32, %arg1: i32) -> (i32, i32) {
    %c0_i32 = arith.constant 0 : i32
    %c0_i32_0 = arith.constant 0 : i32
    %c0_i32_1 = arith.constant 0 : i32
    return %c0_i32, %c0_i32_0 : i32, i32
  }
  func.func @transform_5(%arg0: i32, %arg1: i32) -> (i32, i32) {
    %c0_i32 = arith.constant 0 : i32
    %c0_i32_0 = arith.constant 0 : i32
    %c0_i32_1 = arith.constant 0 : i32
    return %c0_i32, %c0_i32_0 : i32, i32
  }
  func.func @transform_6(%arg0: i32, %arg1: i32) -> (i32, i32) {
    %c0_i32 = arith.constant 0 : i32
    %c0_i32_0 = arith.constant 0 : i32
    %c0_i32_1 = arith.constant 0 : i32
    return %c0_i32, %c0_i32_0 : i32, i32
  }
  func.func @transform_7(%arg0: i32, %arg1: i32) -> (i32, i32) {
    %c0_i32 = arith.constant 0 : i32
    %c0_i32_0 = arith.constant 0 : i32
    return %arg0, %c0_i32 : i32, i32
  }
  func.func @transform_8(%arg0: i32, %arg1: i32) -> (i32, i32) {
    %c0_i32 = arith.constant 0 : i32
    %c0_i32_0 = arith.constant 0 : i32
    return %arg0, %c0_i32 : i32, i32
  }
}

module attributes {stable_mosaic.version = 11 : i64} {
  func.func @_multihead_kernel(%arg0: i32, %arg1: i32, %arg2: memref<8x4x256xf32, #tpu.memory_space<vmem>>, %arg3: memref<8x128xf32, #tpu.memory_space<vmem>>, %arg4: memref<128x128xf32, #tpu.memory_space<vmem>>, %arg5: memref<1x128xf32, #tpu.memory_space<vmem>>, %arg6: memref<1x128xf32, #tpu.memory_space<vmem>>, %arg7: memref<128x128xf32, #tpu.memory_space<vmem>>, %arg8: memref<128x128xf32, #tpu.memory_space<vmem>>, %arg9: memref<8x128xf32, #tpu.memory_space<vmem>>, %arg10: memref<8x128xf32, #tpu.memory_space<vmem>>, %arg11: memref<8x8xf32, #tpu.memory_space<vmem>>) attributes {dimension_semantics = [#tpu.dimension_semantics<parallel>, #tpu.dimension_semantics<arbitrary>], iteration_bounds = array<i64: 1, 1>, scalar_prefetch = 0 : i64, scratch_operands = 1 : i64, tpu.core_type = #tpu.core_type<tc>, window_params = [{transform_indices = @transform_0, window_bounds = array<i64: 8, 4, 256>}, {pipeline_mode = #tpu.pipeline_mode<synchronous>, transform_indices = @transform_1, window_bounds = array<i64: 8, 128>}, {pipeline_mode = #tpu.pipeline_mode<synchronous>, transform_indices = @transform_2, window_bounds = array<i64: 128, 128>}, {pipeline_mode = #tpu.pipeline_mode<synchronous>, transform_indices = @transform_3, window_bounds = array<i64: 1, 128>}, {pipeline_mode = #tpu.pipeline_mode<synchronous>, transform_indices = @transform_4, window_bounds = array<i64: 1, 128>}, {pipeline_mode = #tpu.pipeline_mode<synchronous>, transform_indices = @transform_5, window_bounds = array<i64: 128, 128>}, {pipeline_mode = #tpu.pipeline_mode<synchronous>, transform_indices = @transform_6, window_bounds = array<i64: 128, 128>}, {transform_indices = @transform_7, window_bounds = array<i64: 8, 128>}, {transform_indices = @transform_8, window_bounds = array<i64: 8, 128>}]} {
    %c0_i32 = arith.constant 0 : i32
    %0 = arith.cmpi eq, %arg1, %c0_i32 : i32
    %1 = arith.extui %0 : i1 to i32
    %c0_i32_0 = arith.constant 0 : i32
    %2 = arith.cmpi ne, %1, %c0_i32_0 : i32
    scf.if %2 {
      %cst_9 = arith.constant 0.000000e+00 : f32
      %11 = vector.broadcast %cst_9 : f32 to vector<8x8xf32>
      %c0_10 = arith.constant 0 : index
      %c0_11 = arith.constant 0 : index
      %12 = vector.load %arg11[%c0_10, %c0_11] : memref<8x8xf32, #tpu.memory_space<vmem>>, vector<8x8xf32>
      tpu.vector_store %arg11[%c0_10, %c0_11], %11 {strides = array<i32>} : memref<8x8xf32, #tpu.memory_space<vmem>>, vector<8x8xf32>,
    } else {
    }
    %c0 = arith.constant 0 : index
    %c0_1 = arith.constant 0 : index
    %3 = vector.load %arg11[%c0, %c0_1] : memref<8x8xf32, #tpu.memory_space<vmem>>, vector<8x4xf32>
    %c0_2 = arith.constant 0 : index
    %c0_3 = arith.constant 0 : index
    %c0_4 = arith.constant 0 : index
    %4 = vector.load %arg2[%c0_2, %c0_3, %c0_4] : memref<8x4x256xf32, #tpu.memory_space<vmem>>, vector<8x4x256xf32>
    %cst = arith.constant dense<0.000000e+00> : vector<8x4xf32>
    %5 = vector.multi_reduction <add>, %4, %cst [2] : vector<8x4x256xf32> to vector<8x4xf32>
    %6 = arith.addf %3, %5 : vector<8x4xf32>
    %c0_5 = arith.constant 0 : index
    %c0_6 = arith.constant 0 : index
    %7 = vector.load %arg11[%c0_5, %c0_6] : memref<8x8xf32, #tpu.memory_space<vmem>>, vector<8x4xf32>
    tpu.vector_store %arg11[%c0_5, %c0_6], %6 {strides = array<i32>} : memref<8x8xf32, #tpu.memory_space<vmem>>, vector<8x4xf32>,
    %c0_i32_7 = arith.constant 0 : i32
    %8 = arith.cmpi eq, %arg1, %c0_i32_7 : i32
    %9 = arith.extui %8 : i1 to i32
    %c0_i32_8 = arith.constant 0 : i32
    %10 = arith.cmpi ne, %9, %c0_i32_8 : i32
    scf.if %10 {
      %c0_9 = arith.constant 0 : index
      %c0_10 = arith.constant 0 : index
      %11 = vector.load %arg11[%c0_9, %c0_10] : memref<8x8xf32, #tpu.memory_space<vmem>>, vector<8x8xf32>
      %cst_11 = arith.constant 3.906250e-03 : f32
      %12 = vector.broadcast %cst_11 : f32 to vector<8x8xf32>
      %13 = arith.mulf %11, %12 : vector<8x8xf32>
      %c0_12 = arith.constant 0 : index
      %c0_13 = arith.constant 0 : index
      %14 = vector.load %arg3[%c0_12, %c0_13] : memref<8x128xf32, #tpu.memory_space<vmem>>, vector<8x128xf32>
      %cst_14 = arith.constant dense<0.000000e+00> : vector<8x128xf32>
      %15 = tpu.matmul %13, %14, %cst_14 {dimension_numbers = #tpu.dot_dimension_numbers<[1], [0], [0], [1], [0, 0, 1, 1], [], []>} : vector<8x8xf32>, vector<8x128xf32>, vector<8x128xf32> -> vector<8x128xf32>
      %c0_15 = arith.constant 0 : index
      %c0_16 = arith.constant 0 : index
      %16 = vector.load %arg4[%c0_15, %c0_16] : memref<128x128xf32, #tpu.memory_space<vmem>>, vector<128x128xf32>
      %cst_17 = arith.constant dense<0.000000e+00> : vector<8x128xf32>
      %17 = tpu.matmul %15, %16, %cst_17 {dimension_numbers = #tpu.dot_dimension_numbers<[1], [0], [0], [1], [0, 0, 1, 1], [], []>} : vector<8x128xf32>, vector<128x128xf32>, vector<8x128xf32> -> vector<8x128xf32>
      %c0_18 = arith.constant 0 : index
      %c0_19 = arith.constant 0 : index
      %18 = vector.load %arg5[%c0_18, %c0_19] : memref<1x128xf32, #tpu.memory_space<vmem>>, vector<1x128xf32>
      %19 = vector.broadcast %18 : vector<1x128xf32> to vector<8x128xf32>
      %20 = arith.mulf %17, %19 : vector<8x128xf32>
      %c0_20 = arith.constant 0 : index
      %c0_21 = arith.constant 0 : index
      %21 = vector.load %arg6[%c0_20, %c0_21] : memref<1x128xf32, #tpu.memory_space<vmem>>, vector<1x128xf32>
      %22 = vector.broadcast %21 : vector<1x128xf32> to vector<8x128xf32>
      %23 = arith.addf %20, %22 : vector<8x128xf32>
      %cst_22 = arith.constant 0.000000e+00 : f32
      %24 = vector.broadcast %cst_22 : f32 to vector<8x128xf32>
      %25 = arith.maximumf %23, %24 : vector<8x128xf32>
      %c0_23 = arith.constant 0 : index
      %c0_24 = arith.constant 0 : index
      %26 = vector.load %arg7[%c0_23, %c0_24] : memref<128x128xf32, #tpu.memory_space<vmem>>, vector<128x128xf32>
      %cst_25 = arith.constant dense<0.000000e+00> : vector<8x128xf32>
      %27 = tpu.matmul %25, %26, %cst_25 {dimension_numbers = #tpu.dot_dimension_numbers<[1], [0], [0], [1], [0, 0, 1, 1], [], []>} : vector<8x128xf32>, vector<128x128xf32>, vector<8x128xf32> -> vector<8x128xf32>
      %28 = math.tanh %27 : vector<8x128xf32>
      %c0_26 = arith.constant 0 : index
      %c0_27 = arith.constant 0 : index
      %29 = vector.load %arg9[%c0_26, %c0_27] : memref<8x128xf32, #tpu.memory_space<vmem>>, vector<8x128xf32>
      tpu.vector_store %arg9[%c0_26, %c0_27], %28 {strides = array<i32>} : memref<8x128xf32, #tpu.memory_space<vmem>>, vector<8x128xf32>,
      %30 = arith.mulf %28, %28 : vector<8x128xf32>
      %cst_28 = arith.constant dense<0.000000e+00> : vector<8xf32>
      %31 = vector.multi_reduction <add>, %30, %cst_28 [1] : vector<8x128xf32> to vector<8xf32>
      %32 = vector.shape_cast %31 : vector<8xf32> to vector<8x1xf32>
      %cst_29 = arith.constant 1.000000e-24 : f32
      %33 = vector.broadcast %cst_29 : f32 to vector<8x1xf32>
      %34 = arith.maximumf %32, %33 : vector<8x1xf32>
      %35 = math.rsqrt %34 : vector<8x1xf32>
      %36 = vector.broadcast %35 : vector<8x1xf32> to vector<8x128xf32>
      %37 = arith.mulf %28, %36 : vector<8x128xf32>
      %c0_30 = arith.constant 0 : index
      %c0_31 = arith.constant 0 : index
      %38 = vector.load %arg8[%c0_30, %c0_31] : memref<128x128xf32, #tpu.memory_space<vmem>>, vector<128x128xf32>
      %cst_32 = arith.constant dense<0.000000e+00> : vector<8x128xf32>
      %39 = tpu.matmul %37, %38, %cst_32 {dimension_numbers = #tpu.dot_dimension_numbers<[1], [0], [0], [1], [0, 0, 1, 1], [], []>} : vector<8x128xf32>, vector<128x128xf32>, vector<8x128xf32> -> vector<8x128xf32>
      %cst_33 = arith.constant 3.000000e+01 : f32
      %40 = vector.broadcast %cst_33 : f32 to vector<8x128xf32>
      %41 = arith.mulf %39, %40 : vector<8x128xf32>
      %c0_34 = arith.constant 0 : index
      %c0_35 = arith.constant 0 : index
      %42 = vector.load %arg10[%c0_34, %c0_35] : memref<8x128xf32, #tpu.memory_space<vmem>>, vector<8x128xf32>
      tpu.vector_store %arg10[%c0_34, %c0_35], %41 {strides = array<i32>} : memref<8x128xf32, #tpu.memory_space<vmem>>, vector<8x128xf32>,
    } else {
    }
    return
  }
  func.func @transform_0(%arg0: i32, %arg1: i32) -> (i32, i32, i32) {
    %c0_i32 = arith.constant 0 : i32
    %c0_i32_0 = arith.constant 0 : i32
    return %arg0, %c0_i32, %arg1 : i32, i32, i32
  }
  func.func @transform_1(%arg0: i32, %arg1: i32) -> (i32, i32) {
    %c0_i32 = arith.constant 0 : i32
    %c0_i32_0 = arith.constant 0 : i32
    %c0_i32_1 = arith.constant 0 : i32
    return %c0_i32, %c0_i32_0 : i32, i32
  }
  func.func @transform_2(%arg0: i32, %arg1: i32) -> (i32, i32) {
    %c0_i32 = arith.constant 0 : i32
    %c0_i32_0 = arith.constant 0 : i32
    %c0_i32_1 = arith.constant 0 : i32
    return %c0_i32, %c0_i32_0 : i32, i32
  }
  func.func @transform_3(%arg0: i32, %arg1: i32) -> (i32, i32) {
    %c0_i32 = arith.constant 0 : i32
    %c0_i32_0 = arith.constant 0 : i32
    %c0_i32_1 = arith.constant 0 : i32
    return %c0_i32, %c0_i32_0 : i32, i32
  }
  func.func @transform_4(%arg0: i32, %arg1: i32) -> (i32, i32) {
    %c0_i32 = arith.constant 0 : i32
    %c0_i32_0 = arith.constant 0 : i32
    %c0_i32_1 = arith.constant 0 : i32
    return %c0_i32, %c0_i32_0 : i32, i32
  }
  func.func @transform_5(%arg0: i32, %arg1: i32) -> (i32, i32) {
    %c0_i32 = arith.constant 0 : i32
    %c0_i32_0 = arith.constant 0 : i32
    %c0_i32_1 = arith.constant 0 : i32
    return %c0_i32, %c0_i32_0 : i32, i32
  }
  func.func @transform_6(%arg0: i32, %arg1: i32) -> (i32, i32) {
    %c0_i32 = arith.constant 0 : i32
    %c0_i32_0 = arith.constant 0 : i32
    %c0_i32_1 = arith.constant 0 : i32
    return %c0_i32, %c0_i32_0 : i32, i32
  }
  func.func @transform_7(%arg0: i32, %arg1: i32) -> (i32, i32) {
    %c0_i32 = arith.constant 0 : i32
    %c0_i32_0 = arith.constant 0 : i32
    return %arg0, %c0_i32 : i32, i32
  }
  func.func @transform_8(%arg0: i32, %arg1: i32) -> (i32, i32) {
    %c0_i32 = arith.constant 0 : i32
    %c0_i32_0 = arith.constant 0 : i32
    return %arg0, %c0_i32 : i32, i32
  }
}

</mosaic_0001>

<bundles_post_ra>
// kernel: tpu_custom_call.1
= control target key start
LH: loop header
LB: loop body
LE: loop exit
PB: predicated region body
PF: predicated region fallthrough
CT: control target
= control target key end

     0   :  { %14 = vsyncpa [#allocation4], 0  ;;  %s1142_s0 = inlined_call_operand.hbm [shape: f32[8,4,256], index: 0, kind: input, shape index: {}]   ;;  %s1143_s1 = inlined_call_operand.hbm [shape: f32[8,128], index: 1, kind: input, shape index: {}]   ;;  %s1144_s2 = inlined_call_operand.hbm [shape: f32[128,128], index: 2, kind: input, shape index: {}]   ;;  %s1145_s3 = inlined_call_operand.vmem [shape: f32[1,128], index: 3, kind: input, shape index: {}]   ;;  %s1146_s4 = inlined_call_operand.vmem [shape: f32[1,128], index: 4, kind: input, shape index: {}]   ;;  %s1147_s5 = inlined_call_operand.hbm [shape: f32[128,128], index: 5, kind: input, shape index: {}]   ;;  %s1148_s6 = inlined_call_operand.hbm [shape: f32[128,128], index: 6, kind: input, shape index: {}]   ;;  %s1149_s7 = inlined_call_operand.hbm [shape: f32[8,128], index: 7, kind: output, shape index: {0}]   ;;  %s1150_s8 = inlined_call_operand.hbm [shape: f32[8,128], index: 8, kind: output, shape index: {1}]  }
   0x1   :  { %15 = vsyncpa [#allocation7], 0 }
   0x2   :  { %16 = vsyncpa [#allocation10], 0 }
   0x3   :  { %17 = vsyncpa [#allocation5], 0 }
   0x4   :  { %18 = vsyncpa [#allocation14], 0  ;;  %s971_s27 = smov [#allocation6]  }
   0x5   :  { %s37_s28 = sshll.u32 %s971_s27, 4  ;;  %s38_s28 = int_to_ptr.vmem [resolvable:$true] %s37_s28 }
   0x6   :  { %s829_s29 = scalar_lea.vmem %s38_s28, 128  ;;  %p834_p1 = scmp.lt.s32.totalorder %s38_s28, %s38_s28 }
   0x7   :  { %p830_p0 = scmp.ne.s32.totalorder %s38_s28, %s829_s29  ;;  %p835_p2 = scmp.lt.s32.totalorder %s829_s29, %s829_s29 }
   0x9   :  { %p836_p3 = por %p835_p2, %p834_p1 }
   0xb   :  { %p837_p4 = pnand %p836_p3, %p830_p0 }
   0xd   :  { %840 = shalt.err (!%p837_p4)
}
   0xe   :  { %40 = dma.hbm_to_vmem [thread:$0]  %s1143_s1, 128, %s38_s28, [#allocation7]  }
   0xf   :  { %s972_s10 = smov [#allocation9]   ;;  %s973_s12 = smov [#allocation3]  }
  0x10   :  { %s62_s11 = sshll.u32 %s972_s10, 4  ;;  %s24_s13 = sshll.u32 %s973_s12, 4  ;;  %s63_s11 = int_to_ptr.vmem [resolvable:$true] %s62_s11  ;;  %s25_s13 = int_to_ptr.vmem [resolvable:$true] %s24_s13 }
  0x11   :  { %s849_s14 = scalar_lea.vmem %s63_s11, 2048  ;;  %p854_p6 = scmp.lt.s32.totalorder %s63_s11, %s63_s11 }
  0x12   :  { %p850_p5 = scmp.ne.s32.totalorder %s63_s11, %s849_s14  ;;  %p855_p7 = scmp.lt.s32.totalorder %s849_s14, %s849_s14 }
  0x14   :  { %p856_p8 = por %p855_p7, %p854_p6 }
  0x16   :  { %p857_p9 = pnand %p856_p8, %p850_p5 }
  0x18   :  { %860 = shalt.err (!%p857_p9)
}
  0x19   :  { %s974_s15 = smov 128   ;;  %s975_s16 = smov 8  }
  0x1a   :  { %68 = dma.hbm_to_vmem [thread:$0]  %s1147_s5, 2048, %s63_s11, [#allocation10], %s974_s15, %s974_s15, %s975_s16  }
  0x1b   :  { %s869_s1 = scalar_lea.vmem %s25_s13, 1024  ;;  %p874_p11 = scmp.lt.s32.totalorder %s25_s13, %s25_s13 }
  0x1c   :  { %p870_p10 = scmp.ne.s32.totalorder %s25_s13, %s869_s1  ;;  %p875_p12 = scmp.lt.s32.totalorder %s869_s1, %s869_s1 }
  0x1e   :  { %p876_p13 = por %p875_p12, %p874_p11 }
  0x20   :  { %p877_p0 = pnand %p876_p13, %p870_p10 }
  0x22   :  { %880 = shalt.err (!%p877_p0)
}
  0x23   :  { %30 = dma.hbm_to_vmem [thread:$0]  %s1142_s0, 1024, %s25_s13, [#allocation4], %s974_s15, %s974_s15, %s975_s16  }
  0x24   :  { %s976_s21 = smov [#allocation8]   ;;  %s977_s23 = smov [#allocation11]  }
  0x25   :  { %s46_s22 = sshll.u32 %s976_s21, 4  ;;  %s74_s5 = sshll.u32 %s977_s23, 4  ;;  %s47_s22 = int_to_ptr.vmem [resolvable:$true] %s46_s22  ;;  %s75_s5 = int_to_ptr.vmem [resolvable:$true] %s74_s5 }
  0x26   :  { %s889_s24 = scalar_lea.vmem %s47_s22, 2048  ;;  %p894_p2 = scmp.lt.s32.totalorder %s47_s22, %s47_s22 }
  0x27   :  { %p890_p1 = scmp.ne.s32.totalorder %s47_s22, %s889_s24  ;;  %p895_p3 = scmp.lt.s32.totalorder %s889_s24, %s889_s24 }
  0x29   :  { %p896_p4 = por %p895_p3, %p894_p2 }
  0x2b   :  { %p897_p5 = pnand %p896_p4, %p890_p1 }
  0x2d   :  { %900 = shalt.err (!%p897_p5)
}
  0x2e   :  { %52 = dma.hbm_to_vmem [thread:$0]  %s1144_s2, 2048, %s47_s22, [#allocation7], %s974_s15, %s974_s15, %s975_s16  }
  0x2f   :  { %s909_s0 = scalar_lea.vmem %s75_s5, 2048  ;;  %p914_p7 = scmp.lt.s32.totalorder %s75_s5, %s75_s5 }
  0x30   :  { %p910_p6 = scmp.ne.s32.totalorder %s75_s5, %s909_s0  ;;  %p915_p8 = scmp.lt.s32.totalorder %s909_s0, %s909_s0 }
  0x32   :  { %p916_p9 = por %p915_p8, %p914_p7 }
  0x34   :  { %p917_p10 = pnand %p916_p9, %p910_p6 }
  0x36   :  { %920 = shalt.err (!%p917_p10)
}
  0x37   :  { %80 = dma.hbm_to_vmem [thread:$0]  %s1148_s6, 2048, %s75_s5, [#allocation10], %s974_s15, %s974_s15, %s975_s16  }
  0x38   :  { %961 = dma.done.wait [#allocation4], 1024  }
  0x39   :  { %962 = vsyncadd [#allocation4], 4294966272 }
  0x3a   :  { %963 = dma.done.wait [#allocation7], 2176  }
  0x3b   :  { %964 = vsyncadd [#allocation7], 4294965120 }
  0x3c   :  { %965 = dma.done.wait [#allocation10], 4096  }
  0x3d   :  { %966 = vsyncadd [#allocation10], 4294963200  ;;  %vm135_vm0 = vcmask 1043456   ;;  %v103_v0 = vld [vmem:[#allocation3] sm:$0xff]  ;;  %v105_v1 = vld [vmem:[#allocation3 + $0x10] sm:$0xff]  ;;  %vm100_vm1 = vcmask 64512   ;;  %v184_v57 = vlaneseq }
  0x3e   :  { %v104_v2 = vld [vmem:[#allocation3 + $0x8] sm:$0xff]  ;;  %v119_v3 = vcombine.high %v103_v0, %v103_v0  ;;  %v136_v4 = vsel %vm135_vm0, %v103_v0, 0.0  ;;  %v121_v5 = vcombine.high %v105_v1, %v105_v1  ;;  %v146_v6 = vsel %vm135_vm0, %v105_v1, 0.0  ;;  %v106_v7 = vld [vmem:[#allocation3 + $0x18] sm:$0xff]  ;;  %v107_v8 = vld [vmem:[#allocation3 + $0x20] sm:$0xff] }
  0x3f   :  { %v120_v9 = vcombine.high %v104_v2, %v104_v2  ;;  %v141_v10 = vsel %vm135_vm0, %v104_v2, 0.0  ;;  %v122_v11 = vcombine.high %v106_v7, %v106_v7  ;;  %v108_v12 = vld [vmem:[#allocation3 + $0x28] sm:$0xff]  ;;  %v151_v15 = vsel %vm135_vm0, %v106_v7, 0.0  ;;  %v109_v21 = vld [vmem:[#allocation3 + $0x30] sm:$0xff]  ;;  %v110_v22 = vld [vmem:[#allocation3 + $0x38] sm:$0xff] }
  0x40   :  { %v137_v13 = vsel %vm135_vm0, %v119_v3, 0.0  ;;  %v147_v14 = vsel %vm135_vm0, %v121_v5, 0.0  ;;  %v123_v16 = vcombine.high %v107_v8, %v107_v8  ;;  %v124_v23 = vcombine.high %v108_v12, %v108_v12  ;;  %v241_v41 = vld [vmem:[#allocation6] sm:$0xff]  ;;  %v330_v43 = vld [vmem:[#allocation8 + $0x70] sm:$0xff]  ;;  %v329_v44 = vld [vmem:[#allocation8 + $0x68] sm:$0xff] }
  0x41   :  { %v138_v17 = vadd.f32 %v137_v13, %v136_v4  ;;  %v148_v18 = vadd.f32 %v147_v14, %v146_v6  ;;  %v142_v19 = vsel %vm135_vm0, %v120_v9, 0.0  ;;  %v152_v20 = vsel %vm135_vm0, %v122_v11, 0.0  ;;  %v331_v42 = vld [vmem:[#allocation8 + $0x78] sm:$0xff]  ;;  %v328_v45 = vld [vmem:[#allocation8 + $0x60] sm:$0xff]  ;;  %v326_v47 = vld [vmem:[#allocation8 + $0x50] sm:$0xff] }
  0x42   :  { %v143_v24 = vadd.f32 %v142_v19, %v141_v10  ;;  %v153_v25 = vadd.f32 %v152_v20, %v151_v15  ;;  %v156_v26 = vsel %vm135_vm0, %v107_v8, 0.0  ;;  %v157_v27 = vsel %vm135_vm0, %v123_v16, 0.0  ;;  %v327_v46 = vld [vmem:[#allocation8 + $0x58] sm:$0xff]  ;;  %v325_v48 = vld [vmem:[#allocation8 + $0x48] sm:$0xff]  ;;  %v324_v49 = vld [vmem:[#allocation8 + $0x40] sm:$0xff] }
  0x43   :  { %139 = vadd.xlane.f32.xlu0 %v138_v17  ;;  %149 = vadd.xlane.f32.xlu1 %v148_v18  ;;  %v161_v28 = vsel %vm135_vm0, %v108_v12, 0.0  ;;  %v162_v29 = vsel %vm135_vm0, %v124_v23, 0.0  ;;  %v125_v30 = vcombine.high %v109_v21, %v109_v21  ;;  %v126_v31 = vcombine.high %v110_v22, %v110_v22  ;;  %v323_v50 = vld [vmem:[#allocation8 + $0x38] sm:$0xff]  ;;  %v322_v51 = vld [vmem:[#allocation8 + $0x30] sm:$0xff]  ;;  %v321_v52 = vld [vmem:[#allocation8 + $0x28] sm:$0xff] }
  0x44   :  { %v158_v32 = vadd.f32 %v157_v27, %v156_v26  ;;  %v163_v33 = vadd.f32 %v162_v29, %v161_v28  ;;  %v166_v34 = vsel %vm135_vm0, %v109_v21, 0.0  ;;  %v171_v36 = vsel %vm135_vm0, %v110_v22, 0.0  ;;  %v320_v53 = vld [vmem:[#allocation8 + $0x20] sm:$0xff]  ;;  %v319_v54 = vld [vmem:[#allocation8 + $0x18] sm:$0xff]  ;;  %v318_v55 = vld [vmem:[#allocation8 + $0x10] sm:$0xff] }
  0x45   :  { %v167_v35 = vsel %vm135_vm0, %v125_v30, 0.0  ;;  %v172_v37 = vsel %vm135_vm0, %v126_v31, 0.0  ;;  %v978_v40 = vmov 0.0   ;;  %vm979_vm2 = vmmov 0   ;;  %v317_v56 = vld [vmem:[#allocation8 + $0x8] sm:$0xff]  ;;  %v433_v26 = vld [vmem:[#allocation9 + $0x70] sm:$0xff] }
  0x46   :  { %v168_v38 = vadd.f32 %v167_v35, %v166_v34  ;;  %v173_v39 = vadd.f32 %v172_v37, %v171_v36  ;;  %688 = vmatprep.subr.mxu0 %v978_v40  ;;  %101 = vst.msk [vmem:[#allocation2] sm:$0xff] %vm100_vm1, %v978_v40  ;;  %693 = vmatprep.subr.mxu1 %v978_v40  ;;  %v185_v58 = vand.u32 127, %v184_v57  ;;  %v187_v59 = vshrl.u32 %v184_v57, 7  ;;  %v432_v27 = vld [vmem:[#allocation9 + $0x68] sm:$0xff]  ;;  %v431_v28 = vld [vmem:[#allocation9 + $0x60] sm:$0xff]  ;;  %v430_v29 = vld [vmem:[#allocation9 + $0x58] sm:$0xff] }
  0x47   :  { %144 = vadd.xlane.f32.xlu0 %v143_v24  ;;  %154 = vadd.xlane.f32.xlu1 %v153_v25  ;;  %vm218_vm3 = vcmask 1041409   ;;  %vm220_vm4 = vcmask 1042434   ;;  %vm222_vm5 = vcmask 1043459   ;;  %vm224_vm6 = vcmask 1044484   ;;  %v316_v24 = vld [vmem:[#allocation8] sm:$0xff]  ;;  %v434_v25 = vld [vmem:[#allocation9 + $0x78] sm:$0xff] }
  0x48   :  { %689 = vmatpush3.msra.mxu0 %v241_v41  ;;  %690 = vmatprep.mubr.msk.f32.mxu0 %vm979_vm2, %v978_v40  ;;  %v188_v62 = vsub.s32 %v185_v58, %v187_v59  ;;  %vm226_vm7 = vcmask 1045509   ;;  %vm228_vm8 = vcmask 1046534   ;;  %vm230_vm9 = vcmask 1047559   ;;  %v429_v30 = vld [vmem:[#allocation9 + $0x50] sm:$0xff]  ;;  %v428_v31 = vld [vmem:[#allocation9 + $0x48] sm:$0xff]  ;;  %v423_v36 = vld [vmem:[#allocation9 + $0x20] sm:$0xff] }
  0x49   :  { %725 = vmatprep.mubr.msk.f32.mxu1 %vm979_vm2, %v978_v40  ;;  %728 = vmatprep.subr.mxu0 %v978_v40  ;;  %vm234_vm10 = vcmask 31744   ;;  %v425_v34 = vld [vmem:[#allocation9 + $0x30] sm:$0xff]  ;;  %v424_v35 = vld [vmem:[#allocation9 + $0x28] sm:$0xff] }
  0x4a   :  { %694 = vmatpush3.msra.mxu1 %v331_v42  ;;  %v421_v41 = vld [vmem:[#allocation9 + $0x10] sm:$0xff]  ;;  %v420_v42 = vld [vmem:[#allocation9 + $0x8] sm:$0xff] }
  0x4b   :  { %159 = vadd.xlane.f32.xlu0 %v158_v32  ;;  %164 = vadd.xlane.f32.xlu1 %v163_v33  ;;  %v427_v32 = vld [vmem:[#allocation9 + $0x40] sm:$0xff]  ;;  %v426_v33 = vld [vmem:[#allocation9 + $0x38] sm:$0xff]  ;;  %v522_v57 = vld [vmem:[#allocation11 + $0x48] sm:$0xff] }
  0x4c   :  { %695 = vmatprep.subr.mxu1 %v978_v40 }
  0x4d   :  { %696 = vmatpush3.msra.mxu1 %v330_v43  ;;  %v102_v18 = vld [vmem:[#allocation2] sm:$0xff]  ;;  %v419_v43 = vld [vmem:[#allocation9] sm:$0xff] }
  0x4e   :  { %697 = vmatprep.subr.mxu1 %v978_v40 }
  0x4f   :  { %169 = vadd.xlane.f32.xlu0 %v168_v38  ;;  %174 = vadd.xlane.f32.xlu1 %v173_v39  ;;  %v422_v39 = vld [vmem:[#allocation9 + $0x18] sm:$0xff] }
  0x50   :  { %698 = vmatpush3.msra.mxu1 %v329_v44  ;;  %v633_v44 = vld [vmem:[%s1145_s3] ss:$0 sm:$0xff]  ;;  %s980_s3 = smov [#allocation12]  }
  0x51   :  { %699 = vmatprep.subr.mxu1 %v978_v40 }
  0x52   :  { %700 = vmatpush3.msra.mxu1 %v328_v45 }
  0x53   :  { %701 = vmatprep.subr.mxu1 %v978_v40 }
  0x54   :  { %702 = vmatpush3.msra.mxu1 %v327_v46  ;;  %v634_v46 = vld [vmem:[%s1146_s4] ss:$0 sm:$0xff]  ;;  %s607_s4 = sshll.u32 %s980_s3, 4  ;;  %s608_s4 = int_to_ptr.vmem [resolvable:$true] %s607_s4 }
  0x55   :  { %703 = vmatprep.subr.mxu1 %v978_v40  ;;  %s921_s9 = scalar_lea.vmem %s608_s4, 128  ;;  %p926_p12 = scmp.lt.s32.totalorder %s608_s4, %s608_s4 }
  0x56   :  { %704 = vmatpush3.msra.mxu1 %v326_v47  ;;  %p922_p11 = scmp.ne.s32.totalorder %s608_s4, %s921_s9  ;;  %p927_p13 = scmp.lt.s32.totalorder %s921_s9, %s921_s9 }
  0x57   :  { %705 = vmatprep.subr.mxu1 %v978_v40 }
  0x58   :  { %706 = vmatpush3.msra.mxu1 %v325_v48  ;;  %p928_p0 = por %p927_p13, %p926_p12 }
  0x59   :  { %707 = vmatprep.subr.mxu1 %v978_v40 }
  0x5a   :  { %708 = vmatpush3.msra.mxu1 %v324_v49  ;;  %p929_p1 = pnand %p928_p0, %p922_p11 }
  0x5b   :  { %709 = vmatprep.subr.mxu1 %v978_v40 }
  0x5c   :  { %710 = vmatpush3.msra.mxu1 %v323_v50 }
  0x5d   :  { %711 = vmatprep.subr.mxu1 %v978_v40 }
  0x5e   :  { %712 = vmatpush3.msra.mxu1 %v322_v51  ;;  %v528_v51 = vld [vmem:[#allocation11 + $0x78] sm:$0xff] }
  0x5f   :  { %713 = vmatprep.subr.mxu1 %v978_v40 }
  0x60   :  { %714 = vmatpush3.msra.mxu1 %v321_v52  ;;  %v527_v52 = vld [vmem:[#allocation11 + $0x70] sm:$0xff] }
  0x61   :  { %715 = vmatprep.subr.mxu1 %v978_v40 }
  0x62   :  { %716 = vmatpush3.msra.mxu1 %v320_v53  ;;  %v526_v53 = vld [vmem:[#allocation11 + $0x68] sm:$0xff] }
  0x63   :  { %717 = vmatprep.subr.mxu1 %v978_v40 }
  0x64   :  { %718 = vmatpush3.msra.mxu1 %v319_v54  ;;  %v525_v54 = vld [vmem:[#allocation11 + $0x60] sm:$0xff] }
  0x65   :  { %719 = vmatprep.subr.mxu1 %v978_v40 }
  0x66   :  { %720 = vmatpush3.msra.mxu1 %v318_v55  ;;  %v524_v55 = vld [vmem:[#allocation11 + $0x58] sm:$0xff] }
  0x67   :  { %721 = vmatprep.subr.mxu1 %v978_v40 }
  0x68   :  { %722 = vmatpush3.msra.mxu1 %v317_v56  ;;  %v523_v56 = vld [vmem:[#allocation11 + $0x50] sm:$0xff] }
  0x69   :  { %723 = vmatprep.subr.mxu1 %v978_v40 }
  0x6a   :  { %724 = vmatpush3.msra.mxu1 %v316_v24 }
  0x6b   :  { %763 = vmatprep.subr.mxu1 %v978_v40 }
  0xcc   :  { %v140_v60 = vpop.xlane.xlu0 %139  ;;  %v150_v61 = vpop.xlane.xlu1 %149 }
  0xcd   :  { %v189_v1 = vrot.slane %v140_v60, %v188_v62  ;;  %v197_v4 = vrot.slane %v150_v61, %v188_v62 }
  0xd0   :  { %v145_v63 = vpop.xlane.xlu0 %144  ;;  %v155_v0 = vpop.xlane.xlu1 %154 }
  0xd1   :  { %v193_v2 = vrot.slane %v145_v63, %v188_v62  ;;  %v201_v3 = vrot.slane %v155_v0, %v188_v62  ;;  %v520_v63 = vld [vmem:[#allocation11 + $0x38] sm:$0xff]  ;;  %v519_v0 = vld [vmem:[#allocation11 + $0x30] sm:$0xff] }
  0xd3   :  { %v219_v5 = vsel %vm218_vm3, %v193_v2, %v189_v1  ;;  %v518_v1 = vld [vmem:[#allocation11 + $0x28] sm:$0xff]  ;;  %v517_v2 = vld [vmem:[#allocation11 + $0x20] sm:$0xff] }
  0xd4   :  { %v221_v6 = vsel %vm220_vm4, %v197_v4, %v219_v5  ;;  %v160_v7 = vpop.xlane.xlu0 %159  ;;  %v165_v8 = vpop.xlane.xlu1 %164  ;;  %v515_v4 = vld [vmem:[#allocation11 + $0x10] sm:$0xff]  ;;  %v514_v5 = vld [vmem:[#allocation11 + $0x8] sm:$0xff] }
  0xd5   :  { %v223_v9 = vsel %vm222_vm5, %v201_v3, %v221_v6  ;;  %v205_v10 = vrot.slane %v160_v7, %v188_v62  ;;  %v209_v11 = vrot.slane %v165_v8, %v188_v62  ;;  %v516_v3 = vld [vmem:[#allocation11 + $0x18] sm:$0xff]  ;;  %v513_v6 = vld [vmem:[#allocation11] sm:$0xff] }
  0xd7   :  { %v225_v12 = vsel %vm224_vm6, %v205_v10, %v223_v9 }
  0xd8   :  { %v170_v13 = vpop.xlane.xlu0 %169  ;;  %v175_v14 = vpop.xlane.xlu1 %174  ;;  %v227_v17 = vsel %vm226_vm7, %v209_v11, %v225_v12 }
  0xd9   :  { %v213_v15 = vrot.slane %v170_v13, %v188_v62  ;;  %v217_v16 = vrot.slane %v175_v14, %v188_v62  ;;  %v521_v62 = vld [vmem:[#allocation11 + $0x40] sm:$0xff] }
  0xdb   :  { %v229_v19 = vsel %vm228_vm8, %v213_v15, %v227_v17 }
  0xdc   :  { %v231_v20 = vsel %vm230_vm9, %v217_v16, %v229_v19 }
  0xdd   :  { %v233_v21 = vadd.f32 %v231_v20, %v102_v18 }
  0xdf   :  { %235 = vst.msk [vmem:[#allocation2] sm:$0xff] %vm234_vm10, %v233_v21 }
  0xe6   :  { %v239_v22 = vld [vmem:[#allocation2] sm:$0xff] }
  0xe7   :  { %v240_v23 = vmul.f32 0.00390625, %v239_v22 }
  0xe9   :  { %691 = vmatmul.mubr.msk.f32.vlgmr.msra.gmra.mxu0 %vm100_vm1, %v240_v23 }
  0xea   :  { %760 = vmatprep.mubr.msk.f32.mxu0 %vm979_vm2, %v978_v40  ;;  %729 = vmatpush3.msra.mxu0 %v434_v25 }
  0xeb   :  { %730 = vmatprep.subr.mxu0 %v978_v40 }
  0xec   :  { %731 = vmatpush3.msra.mxu0 %v433_v26 }
  0xed   :  { %732 = vmatprep.subr.mxu0 %v978_v40 }
  0xee   :  { %733 = vmatpush3.msra.mxu0 %v432_v27 }
  0xef   :  { %734 = vmatprep.subr.mxu0 %v978_v40 }
  0xf0   :  { %735 = vmatpush3.msra.mxu0 %v431_v28 }
  0xf1   :  { %736 = vmatprep.subr.mxu0 %v978_v40 }
  0xf2   :  { %737 = vmatpush3.msra.mxu0 %v430_v29 }
  0xf3   :  { %738 = vmatprep.subr.mxu0 %v978_v40 }
  0xf4   :  { %739 = vmatpush3.msra.mxu0 %v429_v30 }
  0xf5   :  { %740 = vmatprep.subr.mxu0 %v978_v40 }
  0xf6   :  { %741 = vmatpush3.msra.mxu0 %v428_v31 }
  0xf7   :  { %742 = vmatprep.subr.mxu0 %v978_v40 }
  0xf8   :  { %743 = vmatpush3.msra.mxu0 %v427_v32 }
  0xf9   :  { %744 = vmatprep.subr.mxu0 %v978_v40 }
  0xfa   :  { %745 = vmatpush3.msra.mxu0 %v426_v33 }
  0xfb   :  { %746 = vmatprep.subr.mxu0 %v978_v40 }
  0xfc   :  { %747 = vmatpush3.msra.mxu0 %v425_v34 }
  0xfd   :  { %748 = vmatprep.subr.mxu0 %v978_v40 }
  0xfe   :  { %749 = vmatpush3.msra.mxu0 %v424_v35 }
  0xff   :  { %750 = vmatprep.subr.mxu0 %v978_v40 }
 0x100   :  { %751 = vmatpush3.msra.mxu0 %v423_v36 }
 0x101   :  { %752 = vmatprep.subr.mxu0 %v978_v40 }
 0x102   :  { %753 = vmatpush3.msra.mxu0 %v422_v39 }
 0x103   :  { %754 = vmatprep.subr.mxu0 %v978_v40 }
 0x104   :  { %755 = vmatpush3.msra.mxu0 %v421_v41 }
 0x105   :  { %756 = vmatprep.subr.mxu0 %v978_v40 }
 0x106   :  { %757 = vmatpush3.msra.mxu0 %v420_v42 }
 0x107   :  { %758 = vmatprep.subr.mxu0 %v978_v40 }
 0x108   :  { %759 = vmatpush3.msra.mxu0 %v419_v43 }
 0x1a9   :  { %v312_v37 = vpop.f32.mrf.mxu0 }
 0x1aa   :  { %726 = vmatmul.mubr.f32.vlgmr.msra.gmra.mxu1 %v312_v37 }
 0x1ab   :  { %v692_v38 = vpop.f32.mrf.mxu0  ;;  %795 = vmatprep.mubr.msk.f32.mxu1 %vm979_vm2, %v978_v40  ;;  %764 = vmatpush3.msra.mxu1 %v528_v51 }
 0x1ac   :  { %765 = vmatprep.subr.mxu1 %v978_v40 }
 0x1ad   :  { %766 = vmatpush3.msra.mxu1 %v527_v52 }
 0x1ae   :  { %767 = vmatprep.subr.mxu1 %v978_v40 }
 0x1af   :  { %768 = vmatpush3.msra.mxu1 %v526_v53 }
 0x1b0   :  { %769 = vmatprep.subr.mxu1 %v978_v40 }
 0x1b1   :  { %770 = vmatpush3.msra.mxu1 %v525_v54 }
 0x1b2   :  { %771 = vmatprep.subr.mxu1 %v978_v40 }
 0x1b3   :  { %772 = vmatpush3.msra.mxu1 %v524_v55 }
 0x1b4   :  { %773 = vmatprep.subr.mxu1 %v978_v40 }
 0x1b5   :  { %774 = vmatpush3.msra.mxu1 %v523_v56 }
 0x1b6   :  { %775 = vmatprep.subr.mxu1 %v978_v40 }
 0x1b7   :  { %776 = vmatpush3.msra.mxu1 %v522_v57 }
 0x1b8   :  { %777 = vmatprep.subr.mxu1 %v978_v40 }
 0x1b9   :  { %778 = vmatpush3.msra.mxu1 %v521_v62 }
 0x1ba   :  { %779 = vmatprep.subr.mxu1 %v978_v40 }
 0x1bb   :  { %780 = vmatpush3.msra.mxu1 %v520_v63 }
 0x1bc   :  { %781 = vmatprep.subr.mxu1 %v978_v40 }
 0x1bd   :  { %782 = vmatpush3.msra.mxu1 %v519_v0 }
 0x1be   :  { %783 = vmatprep.subr.mxu1 %v978_v40 }
 0x1bf   :  { %784 = vmatpush3.msra.mxu1 %v518_v1 }
 0x1c0   :  { %785 = vmatprep.subr.mxu1 %v978_v40 }
 0x1c1   :  { %786 = vmatpush3.msra.mxu1 %v517_v2 }
 0x1c2   :  { %787 = vmatprep.subr.mxu1 %v978_v40 }
 0x1c3   :  { %788 = vmatpush3.msra.mxu1 %v516_v3 }
 0x1c4   :  { %789 = vmatprep.subr.mxu1 %v978_v40 }
 0x1c5   :  { %790 = vmatpush3.msra.mxu1 %v515_v4 }
 0x1c6   :  { %791 = vmatprep.subr.mxu1 %v978_v40 }
 0x1c7   :  { %792 = vmatpush3.msra.mxu1 %v514_v5 }
 0x1c8   :  { %793 = vmatprep.subr.mxu1 %v978_v40 }
 0x1c9   :  { %794 = vmatpush3.msra.mxu1 %v513_v6 }
 0x26a   :  { %v398_v45 = vpop.f32.mrf.mxu1 }
 0x26b   :  { %v409_v47 = vmul.f32 %v633_v44, %v398_v45 }
 0x26c   :  { %v727_v48 = vpop.f32.mrf.mxu1 }
 0x26d   :  { %v417_v49 = vadd.f32 %v634_v46, %v409_v47 }
 0x26f   :  { %v418_v50 = vmax.f32 %v417_v49, 0.0 }
 0x271   :  { %761 = vmatmul.mubr.f32.vlgmr.msra.gmra.mxu0 %v418_v50 }
 0x331   :  { %v501_v58 = vpop.f32.mrf.mxu0 }
 0x332   :  { %817 = vtanh.f32 %v501_v58 }
 0x333   :  { %v762_v59 = vpop.f32.mrf.mxu0 }
 0x33f   :  { %v818_v60 = vpop.eup %817 }
 0x340   :  { %506 = vst [vmem:[#allocation12] sm:$0xff] %v818_v60  ;;  %v507_v61 = vmul.f32 %v818_v60, %v818_v60 }
 0x342   :  { %508 = vadd.xlane.f32.xlu0 %v507_v61 }
 0x3cb   :  { %v509_v7 = vpop.xlane.xlu0 %508 }
 0x3cc   :  { %v510_v8 = vmax.f32 %v509_v7, 1e-24 }
 0x3ce   :  { %819 = vrsqrt.f32 %v510_v8 }
 0x3db   :  { %v820_v9 = vpop.eup %819 }
 0x3dc   :  { %v512_v10 = vmul.f32 %v820_v9, %v818_v60 }
 0x3de   :  { %796 = vmatmul.mubr.f32.vlgmr.msra.gmra.mxu1 %v512_v10 }
 0x3df   :  { %932 = shalt.err (!%p929_p1)
}
 0x3e0   :  { %610 = dma.vmem_to_hbm [thread:$0]  %s608_s4, 128, %s1149_s7, [#allocation5]  }
 0x3e1   :  { %s981_s12 = smov [#allocation13]  }
 0x3e2   :  { %s617_s13 = sshll.u32 %s981_s12, 4  ;;  %s618_s13 = int_to_ptr.vmem [resolvable:$true] %s617_s13 }
 0x3e3   :  { %s941_s14 = scalar_lea.vmem %s618_s13, 128  ;;  %p946_p3 = scmp.lt.s32.totalorder %s618_s13, %s618_s13 }
 0x3e4   :  { %p942_p2 = scmp.ne.s32.totalorder %s618_s13, %s941_s14  ;;  %p947_p4 = scmp.lt.s32.totalorder %s941_s14, %s941_s14 }
 0x3e6   :  { %p948_p5 = por %p947_p4, %p946_p3 }
 0x3e8   :  { %p949_p6 = pnand %p948_p5, %p942_p2 }
 0x49e   :  { %v595_v40 = vpop.f32.mrf.mxu1 }
 0x49f   :  { %v599_v11 = vmul.f32 30.0, %v595_v40 }
 0x4a0   :  { %v797_v12 = vpop.f32.mrf.mxu1 }
 0x4a1   :  { %600 = vst [vmem:[#allocation13] sm:$0xff] %v599_v11 }
 0x4a2   :  { %952 = shalt.err (!%p949_p6)
}
 0x4a3   :  { %620 = dma.vmem_to_hbm [thread:$0]  %s618_s13, 128, %s1150_s8, [#allocation14]  }
 0x4a4   :  { %967 = dma.done.wait [#allocation5], 128  }
 0x4a5   :  { %968 = vsyncadd [#allocation5], 4294967168 }
 0x4a6   :  { %969 = dma.done.wait [#allocation14], 128  }
 0x4a7   :  { %970 = vsyncadd [#allocation14], 4294967168 }
 0x4a8   :  { %627 = vsyncpa [#allocation4], 1 }
 0x4a9   :  { %628 = vsyncpa [#allocation7], 1 }
 0x4aa   :  { %629 = vsyncpa [#allocation10], 1 }
 0x4ab   :  { %630 = vsyncpa [#allocation5], 1 }
 0x4ac   :  { %631 = vsyncpa [#allocation14], 1 }

// kernel: tpu_custom_call.1
= control target key start
LH: loop header
LB: loop body
LE: loop exit
PB: predicated region body
PF: predicated region fallthrough
CT: control target
= control target key end

     0   :  { %14 = vsyncpa [#allocation4], 0  ;;  %s1142_s0 = inlined_call_operand.hbm [shape: f32[8,4,256], index: 0, kind: input, shape index: {}]   ;;  %s1143_s1 = inlined_call_operand.hbm [shape: f32[8,128], index: 1, kind: input, shape index: {}]   ;;  %s1144_s2 = inlined_call_operand.hbm [shape: f32[128,128], index: 2, kind: input, shape index: {}]   ;;  %s1145_s3 = inlined_call_operand.vmem [shape: f32[1,128], index: 3, kind: input, shape index: {}]   ;;  %s1146_s4 = inlined_call_operand.vmem [shape: f32[1,128], index: 4, kind: input, shape index: {}]   ;;  %s1147_s5 = inlined_call_operand.hbm [shape: f32[128,128], index: 5, kind: input, shape index: {}]   ;;  %s1148_s6 = inlined_call_operand.hbm [shape: f32[128,128], index: 6, kind: input, shape index: {}]   ;;  %s1149_s7 = inlined_call_operand.hbm [shape: f32[8,128], index: 7, kind: output, shape index: {0}]   ;;  %s1150_s8 = inlined_call_operand.hbm [shape: f32[8,128], index: 8, kind: output, shape index: {1}]  }
   0x1   :  { %15 = vsyncpa [#allocation7], 0 }
   0x2   :  { %16 = vsyncpa [#allocation10], 0 }
   0x3   :  { %17 = vsyncpa [#allocation5], 0 }
   0x4   :  { %18 = vsyncpa [#allocation14], 0  ;;  %s971_s27 = smov [#allocation6]  }
   0x5   :  { %s37_s28 = sshll.u32 %s971_s27, 4  ;;  %s38_s28 = int_to_ptr.vmem [resolvable:$true] %s37_s28 }
   0x6   :  { %s829_s29 = scalar_lea.vmem %s38_s28, 128  ;;  %p834_p1 = scmp.lt.s32.totalorder %s38_s28, %s38_s28 }
   0x7   :  { %p830_p0 = scmp.ne.s32.totalorder %s38_s28, %s829_s29  ;;  %p835_p2 = scmp.lt.s32.totalorder %s829_s29, %s829_s29 }
   0x9   :  { %p836_p3 = por %p835_p2, %p834_p1 }
   0xb   :  { %p837_p4 = pnand %p836_p3, %p830_p0 }
   0xd   :  { %840 = shalt.err (!%p837_p4)
}
   0xe   :  { %40 = dma.hbm_to_vmem [thread:$0]  %s1143_s1, 128, %s38_s28, [#allocation7]  }
   0xf   :  { %s972_s10 = smov [#allocation9]   ;;  %s973_s12 = smov [#allocation3]  }
  0x10   :  { %s62_s11 = sshll.u32 %s972_s10, 4  ;;  %s24_s13 = sshll.u32 %s973_s12, 4  ;;  %s63_s11 = int_to_ptr.vmem [resolvable:$true] %s62_s11  ;;  %s25_s13 = int_to_ptr.vmem [resolvable:$true] %s24_s13 }
  0x11   :  { %s849_s14 = scalar_lea.vmem %s63_s11, 2048  ;;  %p854_p6 = scmp.lt.s32.totalorder %s63_s11, %s63_s11 }
  0x12   :  { %p850_p5 = scmp.ne.s32.totalorder %s63_s11, %s849_s14  ;;  %p855_p7 = scmp.lt.s32.totalorder %s849_s14, %s849_s14 }
  0x14   :  { %p856_p8 = por %p855_p7, %p854_p6 }
  0x16   :  { %p857_p9 = pnand %p856_p8, %p850_p5 }
  0x18   :  { %860 = shalt.err (!%p857_p9)
}
  0x19   :  { %s974_s15 = smov 128   ;;  %s975_s16 = smov 8  }
  0x1a   :  { %68 = dma.hbm_to_vmem [thread:$0]  %s1147_s5, 2048, %s63_s11, [#allocation10], %s974_s15, %s974_s15, %s975_s16  }
  0x1b   :  { %s869_s1 = scalar_lea.vmem %s25_s13, 1024  ;;  %p874_p11 = scmp.lt.s32.totalorder %s25_s13, %s25_s13 }
  0x1c   :  { %p870_p10 = scmp.ne.s32.totalorder %s25_s13, %s869_s1  ;;  %p875_p12 = scmp.lt.s32.totalorder %s869_s1, %s869_s1 }
  0x1e   :  { %p876_p13 = por %p875_p12, %p874_p11 }
  0x20   :  { %p877_p0 = pnand %p876_p13, %p870_p10 }
  0x22   :  { %880 = shalt.err (!%p877_p0)
}
  0x23   :  { %30 = dma.hbm_to_vmem [thread:$0]  %s1142_s0, 1024, %s25_s13, [#allocation4], %s974_s15, %s974_s15, %s975_s16  }
  0x24   :  { %s976_s21 = smov [#allocation8]   ;;  %s977_s23 = smov [#allocation11]  }
  0x25   :  { %s46_s22 = sshll.u32 %s976_s21, 4  ;;  %s74_s5 = sshll.u32 %s977_s23, 4  ;;  %s47_s22 = int_to_ptr.vmem [resolvable:$true] %s46_s22  ;;  %s75_s5 = int_to_ptr.vmem [resolvable:$true] %s74_s5 }
  0x26   :  { %s889_s24 = scalar_lea.vmem %s47_s22, 2048  ;;  %p894_p2 = scmp.lt.s32.totalorder %s47_s22, %s47_s22 }
  0x27   :  { %p890_p1 = scmp.ne.s32.totalorder %s47_s22, %s889_s24  ;;  %p895_p3 = scmp.lt.s32.totalorder %s889_s24, %s889_s24 }
  0x29   :  { %p896_p4 = por %p895_p3, %p894_p2 }
  0x2b   :  { %p897_p5 = pnand %p896_p4, %p890_p1 }
  0x2d   :  { %900 = shalt.err (!%p897_p5)
}
  0x2e   :  { %52 = dma.hbm_to_vmem [thread:$0]  %s1144_s2, 2048, %s47_s22, [#allocation7], %s974_s15, %s974_s15, %s975_s16  }
  0x2f   :  { %s909_s0 = scalar_lea.vmem %s75_s5, 2048  ;;  %p914_p7 = scmp.lt.s32.totalorder %s75_s5, %s75_s5 }
  0x30   :  { %p910_p6 = scmp.ne.s32.totalorder %s75_s5, %s909_s0  ;;  %p915_p8 = scmp.lt.s32.totalorder %s909_s0, %s909_s0 }
  0x32   :  { %p916_p9 = por %p915_p8, %p914_p7 }
  0x34   :  { %p917_p10 = pnand %p916_p9, %p910_p6 }
  0x36   :  { %920 = shalt.err (!%p917_p10)
}
  0x37   :  { %80 = dma.hbm_to_vmem [thread:$0]  %s1148_s6, 2048, %s75_s5, [#allocation10], %s974_s15, %s974_s15, %s975_s16  }
  0x38   :  { %961 = dma.done.wait [#allocation4], 1024  }
  0x39   :  { %962 = vsyncadd [#allocation4], 4294966272 }
  0x3a   :  { %963 = dma.done.wait [#allocation7], 2176  }
  0x3b   :  { %964 = vsyncadd [#allocation7], 4294965120 }
  0x3c   :  { %965 = dma.done.wait [#allocation10], 4096  }
  0x3d   :  { %966 = vsyncadd [#allocation10], 4294963200  ;;  %vm135_vm0 = vcmask 1043456   ;;  %v103_v0 = vld [vmem:[#allocation3] sm:$0xff]  ;;  %v105_v1 = vld [vmem:[#allocation3 + $0x10] sm:$0xff]  ;;  %vm100_vm1 = vcmask 64512   ;;  %v184_v57 = vlaneseq }
  0x3e   :  { %v104_v2 = vld [vmem:[#allocation3 + $0x8] sm:$0xff]  ;;  %v119_v3 = vcombine.high %v103_v0, %v103_v0  ;;  %v136_v4 = vsel %vm135_vm0, %v103_v0, 0.0  ;;  %v121_v5 = vcombine.high %v105_v1, %v105_v1  ;;  %v146_v6 = vsel %vm135_vm0, %v105_v1, 0.0  ;;  %v106_v7 = vld [vmem:[#allocation3 + $0x18] sm:$0xff]  ;;  %v107_v8 = vld [vmem:[#allocation3 + $0x20] sm:$0xff] }
  0x3f   :  { %v120_v9 = vcombine.high %v104_v2, %v104_v2  ;;  %v141_v10 = vsel %vm135_vm0, %v104_v2, 0.0  ;;  %v122_v11 = vcombine.high %v106_v7, %v106_v7  ;;  %v108_v12 = vld [vmem:[#allocation3 + $0x28] sm:$0xff]  ;;  %v151_v15 = vsel %vm135_vm0, %v106_v7, 0.0  ;;  %v109_v21 = vld [vmem:[#allocation3 + $0x30] sm:$0xff]  ;;  %v110_v22 = vld [vmem:[#allocation3 + $0x38] sm:$0xff] }
  0x40   :  { %v137_v13 = vsel %vm135_vm0, %v119_v3, 0.0  ;;  %v147_v14 = vsel %vm135_vm0, %v121_v5, 0.0  ;;  %v123_v16 = vcombine.high %v107_v8, %v107_v8  ;;  %v124_v23 = vcombine.high %v108_v12, %v108_v12  ;;  %v241_v41 = vld [vmem:[#allocation6] sm:$0xff]  ;;  %v330_v43 = vld [vmem:[#allocation8 + $0x70] sm:$0xff]  ;;  %v329_v44 = vld [vmem:[#allocation8 + $0x68] sm:$0xff] }
  0x41   :  { %v138_v17 = vadd.f32 %v137_v13, %v136_v4  ;;  %v148_v18 = vadd.f32 %v147_v14, %v146_v6  ;;  %v142_v19 = vsel %vm135_vm0, %v120_v9, 0.0  ;;  %v152_v20 = vsel %vm135_vm0, %v122_v11, 0.0  ;;  %v331_v42 = vld [vmem:[#allocation8 + $0x78] sm:$0xff]  ;;  %v328_v45 = vld [vmem:[#allocation8 + $0x60] sm:$0xff]  ;;  %v326_v47 = vld [vmem:[#allocation8 + $0x50] sm:$0xff] }
  0x42   :  { %v143_v24 = vadd.f32 %v142_v19, %v141_v10  ;;  %v153_v25 = vadd.f32 %v152_v20, %v151_v15  ;;  %v156_v26 = vsel %vm135_vm0, %v107_v8, 0.0  ;;  %v157_v27 = vsel %vm135_vm0, %v123_v16, 0.0  ;;  %v327_v46 = vld [vmem:[#allocation8 + $0x58] sm:$0xff]  ;;  %v325_v48 = vld [vmem:[#allocation8 + $0x48] sm:$0xff]  ;;  %v324_v49 = vld [vmem:[#allocation8 + $0x40] sm:$0xff] }
  0x43   :  { %139 = vadd.xlane.f32.xlu0 %v138_v17  ;;  %149 = vadd.xlane.f32.xlu1 %v148_v18  ;;  %v161_v28 = vsel %vm135_vm0, %v108_v12, 0.0  ;;  %v162_v29 = vsel %vm135_vm0, %v124_v23, 0.0  ;;  %v125_v30 = vcombine.high %v109_v21, %v109_v21  ;;  %v126_v31 = vcombine.high %v110_v22, %v110_v22  ;;  %v323_v50 = vld [vmem:[#allocation8 + $0x38] sm:$0xff]  ;;  %v322_v51 = vld [vmem:[#allocation8 + $0x30] sm:$0xff]  ;;  %v321_v52 = vld [vmem:[#allocation8 + $0x28] sm:$0xff] }
  0x44   :  { %v158_v32 = vadd.f32 %v157_v27, %v156_v26  ;;  %v163_v33 = vadd.f32 %v162_v29, %v161_v28  ;;  %v166_v34 = vsel %vm135_vm0, %v109_v21, 0.0  ;;  %v171_v36 = vsel %vm135_vm0, %v110_v22, 0.0  ;;  %v320_v53 = vld [vmem:[#allocation8 + $0x20] sm:$0xff]  ;;  %v319_v54 = vld [vmem:[#allocation8 + $0x18] sm:$0xff]  ;;  %v318_v55 = vld [vmem:[#allocation8 + $0x10] sm:$0xff] }
  0x45   :  { %v167_v35 = vsel %vm135_vm0, %v125_v30, 0.0  ;;  %v172_v37 = vsel %vm135_vm0, %v126_v31, 0.0  ;;  %v978_v40 = vmov 0.0   ;;  %vm979_vm2 = vmmov 0   ;;  %v317_v56 = vld [vmem:[#allocation8 + $0x8] sm:$0xff]  ;;  %v433_v26 = vld [vmem:[#allocation9 + $0x70] sm:$0xff] }
  0x46   :  { %v168_v38 = vadd.f32 %v167_v35, %v166_v34  ;;  %v173_v39 = vadd.f32 %v172_v37, %v171_v36  ;;  %688 = vmatprep.subr.mxu0 %v978_v40  ;;  %101 = vst.msk [vmem:[#allocation2] sm:$0xff] %vm100_vm1, %v978_v40  ;;  %693 = vmatprep.subr.mxu1 %v978_v40  ;;  %v185_v58 = vand.u32 127, %v184_v57  ;;  %v187_v59 = vshrl.u32 %v184_v57, 7  ;;  %v432_v27 = vld [vmem:[#allocation9 + $0x68] sm:$0xff]  ;;  %v431_v28 = vld [vmem:[#allocation9 + $0x60] sm:$0xff]  ;;  %v430_v29 = vld [vmem:[#allocation9 + $0x58] sm:$0xff] }
  0x47   :  { %144 = vadd.xlane.f32.xlu0 %v143_v24  ;;  %154 = vadd.xlane.f32.xlu1 %v153_v25  ;;  %vm218_vm3 = vcmask 1041409   ;;  %vm220_vm4 = vcmask 1042434   ;;  %vm222_vm5 = vcmask 1043459   ;;  %vm224_vm6 = vcmask 1044484   ;;  %v316_v24 = vld [vmem:[#allocation8] sm:$0xff]  ;;  %v434_v25 = vld [vmem:[#allocation9 + $0x78] sm:$0xff] }
  0x48   :  { %689 = vmatpush3.msra.mxu0 %v241_v41  ;;  %690 = vmatprep.mubr.msk.f32.mxu0 %vm979_vm2, %v978_v40  ;;  %v188_v62 = vsub.s32 %v185_v58, %v187_v59  ;;  %vm226_vm7 = vcmask 1045509   ;;  %vm228_vm8 = vcmask 1046534   ;;  %vm230_vm9 = vcmask 1047559   ;;  %v429_v30 = vld [vmem:[#allocation9 + $0x50] sm:$0xff]  ;;  %v428_v31 = vld [vmem:[#allocation9 + $0x48] sm:$0xff]  ;;  %v423_v36 = vld [vmem:[#allocation9 + $0x20] sm:$0xff] }
  0x49   :  { %725 = vmatprep.mubr.msk.f32.mxu1 %vm979_vm2, %v978_v40  ;;  %728 = vmatprep.subr.mxu0 %v978_v40  ;;  %vm234_vm10 = vcmask 31744   ;;  %v425_v34 = vld [vmem:[#allocation9 + $0x30] sm:$0xff]  ;;  %v424_v35 = vld [vmem:[#allocation9 + $0x28] sm:$0xff] }
  0x4a   :  { %694 = vmatpush3.msra.mxu1 %v331_v42  ;;  %v421_v41 = vld [vmem:[#allocation9 + $0x10] sm:$0xff]  ;;  %v420_v42 = vld [vmem:[#allocation9 + $0x8] sm:$0xff] }
  0x4b   :  { %159 = vadd.xlane.f32.xlu0 %v158_v32  ;;  %164 = vadd.xlane.f32.xlu1 %v163_v33  ;;  %v427_v32 = vld [vmem:[#allocation9 + $0x40] sm:$0xff]  ;;  %v426_v33 = vld [vmem:[#allocation9 + $0x38] sm:$0xff]  ;;  %v522_v57 = vld [vmem:[#allocation11 + $0x48] sm:$0xff] }
  0x4c   :  { %695 = vmatprep.subr.mxu1 %v978_v40 }
  0x4d   :  { %696 = vmatpush3.msra.mxu1 %v330_v43  ;;  %v102_v18 = vld [vmem:[#allocation2] sm:$0xff]  ;;  %v419_v43 = vld [vmem:[#allocation9] sm:$0xff] }
  0x4e   :  { %697 = vmatprep.subr.mxu1 %v978_v40 }
  0x4f   :  { %169 = vadd.xlane.f32.xlu0 %v168_v38  ;;  %174 = vadd.xlane.f32.xlu1 %v173_v39  ;;  %v422_v39 = vld [vmem:[#allocation9 + $0x18] sm:$0xff] }
  0x50   :  { %698 = vmatpush3.msra.mxu1 %v329_v44  ;;  %v633_v44 = vld [vmem:[%s1145_s3] ss:$0 sm:$0xff]  ;;  %s980_s3 = smov [#allocation12]  }
  0x51   :  { %699 = vmatprep.subr.mxu1 %v978_v40 }
  0x52   :  { %700 = vmatpush3.msra.mxu1 %v328_v45 }
  0x53   :  { %701 = vmatprep.subr.mxu1 %v978_v40 }
  0x54   :  { %702 = vmatpush3.msra.mxu1 %v327_v46  ;;  %v634_v46 = vld [vmem:[%s1146_s4] ss:$0 sm:$0xff]  ;;  %s607_s4 = sshll.u32 %s980_s3, 4  ;;  %s608_s4 = int_to_ptr.vmem [resolvable:$true] %s607_s4 }
  0x55   :  { %703 = vmatprep.subr.mxu1 %v978_v40  ;;  %s921_s9 = scalar_lea.vmem %s608_s4, 128  ;;  %p926_p12 = scmp.lt.s32.totalorder %s608_s4, %s608_s4 }
  0x56   :  { %704 = vmatpush3.msra.mxu1 %v326_v47  ;;  %p922_p11 = scmp.ne.s32.totalorder %s608_s4, %s921_s9  ;;  %p927_p13 = scmp.lt.s32.totalorder %s921_s9, %s921_s9 }
  0x57   :  { %705 = vmatprep.subr.mxu1 %v978_v40 }
  0x58   :  { %706 = vmatpush3.msra.mxu1 %v325_v48  ;;  %p928_p0 = por %p927_p13, %p926_p12 }
  0x59   :  { %707 = vmatprep.subr.mxu1 %v978_v40 }
  0x5a   :  { %708 = vmatpush3.msra.mxu1 %v324_v49  ;;  %p929_p1 = pnand %p928_p0, %p922_p11 }
  0x5b   :  { %709 = vmatprep.subr.mxu1 %v978_v40 }
  0x5c   :  { %710 = vmatpush3.msra.mxu1 %v323_v50 }
  0x5d   :  { %711 = vmatprep.subr.mxu1 %v978_v40 }
  0x5e   :  { %712 = vmatpush3.msra.mxu1 %v322_v51  ;;  %v528_v51 = vld [vmem:[#allocation11 + $0x78] sm:$0xff] }
  0x5f   :  { %713 = vmatprep.subr.mxu1 %v978_v40 }
  0x60   :  { %714 = vmatpush3.msra.mxu1 %v321_v52  ;;  %v527_v52 = vld [vmem:[#allocation11 + $0x70] sm:$0xff] }
  0x61   :  { %715 = vmatprep.subr.mxu1 %v978_v40 }
  0x62   :  { %716 = vmatpush3.msra.mxu1 %v320_v53  ;;  %v526_v53 = vld [vmem:[#allocation11 + $0x68] sm:$0xff] }
  0x63   :  { %717 = vmatprep.subr.mxu1 %v978_v40 }
  0x64   :  { %718 = vmatpush3.msra.mxu1 %v319_v54  ;;  %v525_v54 = vld [vmem:[#allocation11 + $0x60] sm:$0xff] }
  0x65   :  { %719 = vmatprep.subr.mxu1 %v978_v40 }
  0x66   :  { %720 = vmatpush3.msra.mxu1 %v318_v55  ;;  %v524_v55 = vld [vmem:[#allocation11 + $0x58] sm:$0xff] }
  0x67   :  { %721 = vmatprep.subr.mxu1 %v978_v40 }
  0x68   :  { %722 = vmatpush3.msra.mxu1 %v317_v56  ;;  %v523_v56 = vld [vmem:[#allocation11 + $0x50] sm:$0xff] }
  0x69   :  { %723 = vmatprep.subr.mxu1 %v978_v40 }
  0x6a   :  { %724 = vmatpush3.msra.mxu1 %v316_v24 }
  0x6b   :  { %763 = vmatprep.subr.mxu1 %v978_v40 }
  0xcc   :  { %v140_v60 = vpop.xlane.xlu0 %139  ;;  %v150_v61 = vpop.xlane.xlu1 %149 }
  0xcd   :  { %v189_v1 = vrot.slane %v140_v60, %v188_v62  ;;  %v197_v4 = vrot.slane %v150_v61, %v188_v62 }
  0xd0   :  { %v145_v63 = vpop.xlane.xlu0 %144  ;;  %v155_v0 = vpop.xlane.xlu1 %154 }
  0xd1   :  { %v193_v2 = vrot.slane %v145_v63, %v188_v62  ;;  %v201_v3 = vrot.slane %v155_v0, %v188_v62  ;;  %v520_v63 = vld [vmem:[#allocation11 + $0x38] sm:$0xff]  ;;  %v519_v0 = vld [vmem:[#allocation11 + $0x30] sm:$0xff] }
  0xd3   :  { %v219_v5 = vsel %vm218_vm3, %v193_v2, %v189_v1  ;;  %v518_v1 = vld [vmem:[#allocation11 + $0x28] sm:$0xff]  ;;  %v517_v2 = vld [vmem:[#allocation11 + $0x20] sm:$0xff] }
  0xd4   :  { %v221_v6 = vsel %vm220_vm4, %v197_v4, %v219_v5  ;;  %v160_v7 = vpop.xlane.xlu0 %159  ;;  %v165_v8 = vpop.xlane.xlu1 %164  ;;  %v515_v4 = vld [vmem:[#allocation11 + $0x10] sm:$0xff]  ;;  %v514_v5 = vld [vmem:[#allocation11 + $0x8] sm:$0xff] }
  0xd5   :  { %v223_v9 = vsel %vm222_vm5, %v201_v3, %v221_v6  ;;  %v205_v10 = vrot.slane %v160_v7, %v188_v62  ;;  %v209_v11 = vrot.slane %v165_v8, %v188_v62  ;;  %v516_v3 = vld [vmem:[#allocation11 + $0x18] sm:$0xff]  ;;  %v513_v6 = vld [vmem:[#allocation11] sm:$0xff] }
  0xd7   :  { %v225_v12 = vsel %vm224_vm6, %v205_v10, %v223_v9 }
  0xd8   :  { %v170_v13 = vpop.xlane.xlu0 %169  ;;  %v175_v14 = vpop.xlane.xlu1 %174  ;;  %v227_v17 = vsel %vm226_vm7, %v209_v11, %v225_v12 }
  0xd9   :  { %v213_v15 = vrot.slane %v170_v13, %v188_v62  ;;  %v217_v16 = vrot.slane %v175_v14, %v188_v62  ;;  %v521_v62 = vld [vmem:[#allocation11 + $0x40] sm:$0xff] }
  0xdb   :  { %v229_v19 = vsel %vm228_vm8, %v213_v15, %v227_v17 }
  0xdc   :  { %v231_v20 = vsel %vm230_vm9, %v217_v16, %v229_v19 }
  0xdd   :  { %v233_v21 = vadd.f32 %v231_v20, %v102_v18 }
  0xdf   :  { %235 = vst.msk [vmem:[#allocation2] sm:$0xff] %vm234_vm10, %v233_v21 }
  0xe6   :  { %v239_v22 = vld [vmem:[#allocation2] sm:$0xff] }
  0xe7   :  { %v240_v23 = vmul.f32 0.00390625, %v239_v22 }
  0xe9   :  { %691 = vmatmul.mubr.msk.f32.vlgmr.msra.gmra.mxu0 %vm100_vm1, %v240_v23 }
  0xea   :  { %760 = vmatprep.mubr.msk.f32.mxu0 %vm979_vm2, %v978_v40  ;;  %729 = vmatpush3.msra.mxu0 %v434_v25 }
  0xeb   :  { %730 = vmatprep.subr.mxu0 %v978_v40 }
  0xec   :  { %731 = vmatpush3.msra.mxu0 %v433_v26 }
  0xed   :  { %732 = vmatprep.subr.mxu0 %v978_v40 }
  0xee   :  { %733 = vmatpush3.msra.mxu0 %v432_v27 }
  0xef   :  { %734 = vmatprep.subr.mxu0 %v978_v40 }
  0xf0   :  { %735 = vmatpush3.msra.mxu0 %v431_v28 }
  0xf1   :  { %736 = vmatprep.subr.mxu0 %v978_v40 }
  0xf2   :  { %737 = vmatpush3.msra.mxu0 %v430_v29 }
  0xf3   :  { %738 = vmatprep.subr.mxu0 %v978_v40 }
  0xf4   :  { %739 = vmatpush3.msra.mxu0 %v429_v30 }
  0xf5   :  { %740 = vmatprep.subr.mxu0 %v978_v40 }
  0xf6   :  { %741 = vmatpush3.msra.mxu0 %v428_v31 }
  0xf7   :  { %742 = vmatprep.subr.mxu0 %v978_v40 }
  0xf8   :  { %743 = vmatpush3.msra.mxu0 %v427_v32 }
  0xf9   :  { %744 = vmatprep.subr.mxu0 %v978_v40 }
  0xfa   :  { %745 = vmatpush3.msra.mxu0 %v426_v33 }
  0xfb   :  { %746 = vmatprep.subr.mxu0 %v978_v40 }
  0xfc   :  { %747 = vmatpush3.msra.mxu0 %v425_v34 }
  0xfd   :  { %748 = vmatprep.subr.mxu0 %v978_v40 }
  0xfe   :  { %749 = vmatpush3.msra.mxu0 %v424_v35 }
  0xff   :  { %750 = vmatprep.subr.mxu0 %v978_v40 }
 0x100   :  { %751 = vmatpush3.msra.mxu0 %v423_v36 }
 0x101   :  { %752 = vmatprep.subr.mxu0 %v978_v40 }
 0x102   :  { %753 = vmatpush3.msra.mxu0 %v422_v39 }
 0x103   :  { %754 = vmatprep.subr.mxu0 %v978_v40 }
 0x104   :  { %755 = vmatpush3.msra.mxu0 %v421_v41 }
 0x105   :  { %756 = vmatprep.subr.mxu0 %v978_v40 }
 0x106   :  { %757 = vmatpush3.msra.mxu0 %v420_v42 }
 0x107   :  { %758 = vmatprep.subr.mxu0 %v978_v40 }
 0x108   :  { %759 = vmatpush3.msra.mxu0 %v419_v43 }
 0x1a9   :  { %v312_v37 = vpop.f32.mrf.mxu0 }
 0x1aa   :  { %726 = vmatmul.mubr.f32.vlgmr.msra.gmra.mxu1 %v312_v37 }
 0x1ab   :  { %v692_v38 = vpop.f32.mrf.mxu0  ;;  %795 = vmatprep.mubr.msk.f32.mxu1 %vm979_vm2, %v978_v40  ;;  %764 = vmatpush3.msra.mxu1 %v528_v51 }
 0x1ac   :  { %765 = vmatprep.subr.mxu1 %v978_v40 }
 0x1ad   :  { %766 = vmatpush3.msra.mxu1 %v527_v52 }
 0x1ae   :  { %767 = vmatprep.subr.mxu1 %v978_v40 }
 0x1af   :  { %768 = vmatpush3.msra.mxu1 %v526_v53 }
 0x1b0   :  { %769 = vmatprep.subr.mxu1 %v978_v40 }
 0x1b1   :  { %770 = vmatpush3.msra.mxu1 %v525_v54 }
 0x1b2   :  { %771 = vmatprep.subr.mxu1 %v978_v40 }
 0x1b3   :  { %772 = vmatpush3.msra.mxu1 %v524_v55 }
 0x1b4   :  { %773 = vmatprep.subr.mxu1 %v978_v40 }
 0x1b5   :  { %774 = vmatpush3.msra.mxu1 %v523_v56 }
 0x1b6   :  { %775 = vmatprep.subr.mxu1 %v978_v40 }
 0x1b7   :  { %776 = vmatpush3.msra.mxu1 %v522_v57 }
 0x1b8   :  { %777 = vmatprep.subr.mxu1 %v978_v40 }
 0x1b9   :  { %778 = vmatpush3.msra.mxu1 %v521_v62 }
 0x1ba   :  { %779 = vmatprep.subr.mxu1 %v978_v40 }
 0x1bb   :  { %780 = vmatpush3.msra.mxu1 %v520_v63 }
 0x1bc   :  { %781 = vmatprep.subr.mxu1 %v978_v40 }
 0x1bd   :  { %782 = vmatpush3.msra.mxu1 %v519_v0 }
 0x1be   :  { %783 = vmatprep.subr.mxu1 %v978_v40 }
 0x1bf   :  { %784 = vmatpush3.msra.mxu1 %v518_v1 }
 0x1c0   :  { %785 = vmatprep.subr.mxu1 %v978_v40 }
 0x1c1   :  { %786 = vmatpush3.msra.mxu1 %v517_v2 }
 0x1c2   :  { %787 = vmatprep.subr.mxu1 %v978_v40 }
 0x1c3   :  { %788 = vmatpush3.msra.mxu1 %v516_v3 }
 0x1c4   :  { %789 = vmatprep.subr.mxu1 %v978_v40 }
 0x1c5   :  { %790 = vmatpush3.msra.mxu1 %v515_v4 }
 0x1c6   :  { %791 = vmatprep.subr.mxu1 %v978_v40 }
 0x1c7   :  { %792 = vmatpush3.msra.mxu1 %v514_v5 }
 0x1c8   :  { %793 = vmatprep.subr.mxu1 %v978_v40 }
 0x1c9   :  { %794 = vmatpush3.msra.mxu1 %v513_v6 }
 0x26a   :  { %v398_v45 = vpop.f32.mrf.mxu1 }
 0x26b   :  { %v409_v47 = vmul.f32 %v633_v44, %v398_v45 }
 0x26c   :  { %v727_v48 = vpop.f32.mrf.mxu1 }
 0x26d   :  { %v417_v49 = vadd.f32 %v634_v46, %v409_v47 }
 0x26f   :  { %v418_v50 = vmax.f32 %v417_v49, 0.0 }
 0x271   :  { %761 = vmatmul.mubr.f32.vlgmr.msra.gmra.mxu0 %v418_v50 }
 0x331   :  { %v501_v58 = vpop.f32.mrf.mxu0 }
 0x332   :  { %817 = vtanh.f32 %v501_v58 }
 0x333   :  { %v762_v59 = vpop.f32.mrf.mxu0 }
 0x33f   :  { %v818_v60 = vpop.eup %817 }
 0x340   :  { %506 = vst [vmem:[#allocation12] sm:$0xff] %v818_v60  ;;  %v507_v61 = vmul.f32 %v818_v60, %v818_v60 }
 0x342   :  { %508 = vadd.xlane.f32.xlu0 %v507_v61 }
 0x3cb   :  { %v509_v7 = vpop.xlane.xlu0 %508 }
 0x3cc   :  { %v510_v8 = vmax.f32 %v509_v7, 1e-24 }
 0x3ce   :  { %819 = vrsqrt.f32 %v510_v8 }
 0x3db   :  { %v820_v9 = vpop.eup %819 }
 0x3dc   :  { %v512_v10 = vmul.f32 %v820_v9, %v818_v60 }
 0x3de   :  { %796 = vmatmul.mubr.f32.vlgmr.msra.gmra.mxu1 %v512_v10 }
 0x3df   :  { %932 = shalt.err (!%p929_p1)
}
 0x3e0   :  { %610 = dma.vmem_to_hbm [thread:$0]  %s608_s4, 128, %s1149_s7, [#allocation5]  }
 0x3e1   :  { %s981_s12 = smov [#allocation13]  }
 0x3e2   :  { %s617_s13 = sshll.u32 %s981_s12, 4  ;;  %s618_s13 = int_to_ptr.vmem [resolvable:$true] %s617_s13 }
 0x3e3   :  { %s941_s14 = scalar_lea.vmem %s618_s13, 128  ;;  %p946_p3 = scmp.lt.s32.totalorder %s618_s13, %s618_s13 }
 0x3e4   :  { %p942_p2 = scmp.ne.s32.totalorder %s618_s13, %s941_s14  ;;  %p947_p4 = scmp.lt.s32.totalorder %s941_s14, %s941_s14 }
 0x3e6   :  { %p948_p5 = por %p947_p4, %p946_p3 }
 0x3e8   :  { %p949_p6 = pnand %p948_p5, %p942_p2 }
 0x49e   :  { %v595_v40 = vpop.f32.mrf.mxu1 }
 0x49f   :  { %v599_v11 = vmul.f32 30.0, %v595_v40 }
 0x4a0   :  { %v797_v12 = vpop.f32.mrf.mxu1 }
 0x4a1   :  { %600 = vst [vmem:[#allocation13] sm:$0xff] %v599_v11 }
 0x4a2   :  { %952 = shalt.err (!%p949_p6)
}
 0x4a3   :  { %620 = dma.vmem_to_hbm [thread:$0]  %s618_s13, 128, %s1150_s8, [#allocation14]  }
 0x4a4   :  { %967 = dma.done.wait [#allocation5], 128  }
 0x4a5   :  { %968 = vsyncadd [#allocation5], 4294967168 }
 0x4a6   :  { %969 = dma.done.wait [#allocation14], 128  }
 0x4a7   :  { %970 = vsyncadd [#allocation14], 4294967168 }
 0x4a8   :  { %627 = vsyncpa [#allocation4], 1 }
 0x4a9   :  { %628 = vsyncpa [#allocation7], 1 }
 0x4aa   :  { %629 = vsyncpa [#allocation10], 1 }
 0x4ab   :  { %630 = vsyncpa [#allocation5], 1 }
 0x4ac   :  { %631 = vsyncpa [#allocation14], 1 }

</bundles_post_ra>
